<compile_context>
chip_gen: v7x
topology: tpu7x:2x2x1
jax: 0.10.0
libtpu: 0.0.40
codegen_flags: <defaults>
</compile_context>

<pallas_src>
import numpy as np

import jax
import jax.numpy as jnp
from jax.experimental import pallas as pl
from jax.experimental.pallas import tpu as pltpu


_LEAKY_SLOPE = 0.2


# ----------------------------------------------------------------------------
# Fused Pallas kernel: conv1..conv4 (as dense matmuls) + fc_out, all in VMEM
# ----------------------------------------------------------------------------
def _fused_lab_disc_kernel(x_ref, t1_ref, b1_ref, t2_ref, b2_ref,
                           t3_ref, b3_ref, t4_ref, b4_ref,
                           fcw_ref, fcb_ref, o_ref):
    def layer(a, t_ref, b_ref, leaky):
        y = jnp.dot(a, t_ref[...], preferred_element_type=jnp.float32)
        y = y + b_ref[...]                       # (1, D) broadcasts over rows
        if leaky:
            y = jnp.where(y >= 0.0, y, jnp.float32(_LEAKY_SLOPE) * y)
        return y

    a = x_ref[...]                               # (N, C_in*H*W)
    a = layer(a, t1_ref, b1_ref, True)           # conv1 + LeakyReLU
    a = layer(a, t2_ref, b2_ref, True)           # conv2 + LeakyReLU
    a = layer(a, t3_ref, b3_ref, True)           # conv3 + LeakyReLU
    a = layer(a, t4_ref, b4_ref, False)          # conv4 (no activation)
    o_ref[...] = layer(a, fcw_ref, fcb_ref, False)   # fc_out -> (N, 1)


# ----------------------------------------------------------------------------
# One-time weight preparation (no per-forward reshape/transpose glue)
# ----------------------------------------------------------------------------
def _conv_as_dense(weight, bias, H, W, stride, pad):
    """Lower Conv2d(NCHW, zero pad) to: y_flat = x_flat @ T + b_flat.

    x_flat / y_flat are the NCHW-flattened activations (one row per sample),
    T has shape (C_in*H*W, C_out*Ho*Wo).  Index arrays are static numpy; the
    scatter of the conv weights into T is a single jnp .at[].set.
    """
    C_out, C_in, kh, kw = weight.shape
    Ho = (H + 2 * pad - kh) // stride + 1
    Wo = (W + 2 * pad - kw) // stride + 1

    oo, cc, ii, jj, ho, wo = np.indices((C_out, C_in, kh, kw, Ho, Wo))
    h = ho * stride + ii - pad
    w = wo * stride + jj - pad
    valid = (h >= 0) & (h < H) & (w >= 0) & (w < W)   # out-of-range == zero pad

    rows = (cc * (H * W) + h * W + w)[valid]
    cols = (oo * (Ho * Wo) + ho * Wo + wo)[valid]
    vals = weight[oo[valid], cc[valid], ii[valid], jj[valid]].astype(jnp.float32)

    T = jnp.zeros((C_in * H * W, C_out * Ho * Wo), jnp.float32)
    T = T.at[rows, cols].set(vals)
    b_flat = jnp.repeat(bias.astype(jnp.float32), Ho * Wo).reshape(1, C_out * Ho * Wo)
    return T, b_flat, Ho, Wo


def prepare_fused_params(params, size):
    """Build the kernel-ready operators once from the torch-layout params."""
    H = W = size
    t1, b1, H, W = _conv_as_dense(params["conv1_w"], params["conv1_b"], H, W, 1, 1)
    t2, b2, H, W = _conv_as_dense(params["conv2_w"], params["conv2_b"], H, W, 2, 1)
    t3, b3, H, W = _conv_as_dense(params["conv3_w"], params["conv3_b"], H, W, 1, 1)
    t4, b4, H, W = _conv_as_dense(params["conv4_w"], params["conv4_b"], H, W, 2, 1)
    assert (H, W) == (2, 2), (H, W)              # final_res == 2, as in the module
    fcw = params["fc_w"].astype(jnp.float32)     # (2*ndf*2*2, 1), already (K, N)
    fcb = params["fc_b"].astype(jnp.float32).reshape(1, 1)
    return ((t1, b1), (t2, b2), (t3, b3), (t4, b4), (fcw, fcb))


# ----------------------------------------------------------------------------
# Forward: flatten -> single fused pallas_call -> (N,)
# ----------------------------------------------------------------------------
def lab_discriminator_forward(fused, x):
    N = x.shape[0]
    x_flat = x.reshape(N, -1).astype(jnp.float32)      # NCHW flatten (torch .view order)
    (t1, b1), (t2, b2), (t3, b3), (t4, b4), (fcw, fcb) = fused
    args = (x_flat, t1, b1, t2, b2, t3, b3, t4, b4, fcw, fcb)

    # Single grid point; every operand is one full-array VMEM block
    # (block_shape == array shape lifts the (8,128) divisibility rule).
    in_specs = [pl.BlockSpec(a.shape, lambda i: (0, 0)) for a in args]

    out = pl.pallas_call(
        _fused_lab_disc_kernel,
        out_shape=jax.ShapeDtypeStruct((N, 1), jnp.float32),
        grid=(1,),
        in_specs=in_specs,
        out_specs=pl.BlockSpec((N, 1), lambda i: (0, 0)),
        compiler_params=pltpu.CompilerParams(
            dimension_semantics=("arbitrary",)),
    )(*args)
    return out.reshape(N)                               # matches `assert len(result.shape) == 1`


# ----------------------------------------------------------------------------
# Parameter init (torch layout: Conv2d (C_out, C_in, kh, kw))
# ----------------------------------------------------------------------------
def init_params(key, local_nlabels, ndf):
    ks = jax.random.split(key, 10)
    s = 0.05

    def w(k, shape):
        return jax.random.normal(k, shape, jnp.float32) * s

    return {
        "conv1_w": w(ks[0], (ndf, local_nlabels, 3, 3)),
        "conv1_b": w(ks[1], (ndf,)),
        "conv2_w": w(ks[2], (ndf, ndf, 4, 4)),
        "conv2_b": w(ks[3], (ndf,)),
        "conv3_w": w(ks[4], (2 * ndf, ndf, 3, 3)),
        "conv3_b": w(ks[5], (2 * ndf,)),
        "conv4_w": w(ks[6], (2 * ndf, 2 * ndf, 4, 4)),
        "conv4_b": w(ks[7], (2 * ndf,)),
        # fc_out: LinearUnconditionalLogits(ndf*2 * 2 * 2) -> scalar per sample
        "fc_w": w(ks[8], (2 * ndf * 2 * 2, 1)),
        "fc_b": w(ks[9], (1,)),
    }


# ----------------------------------------------------------------------------
# Pure-JAX reference (for correctness check against real convolutions)
# ----------------------------------------------------------------------------
def _ref_conv(x, w, b, stride, pad, slope=None):
    dn = jax.lax.conv_dimension_numbers(x.shape, w.shape, ("NCHW", "OIHW", "NCHW"))
    y = jax.lax.conv_general_dilated(
        x, w, (stride, stride), ((pad, pad), (pad, pad)), dimension_numbers=dn
    ) + b.reshape(1, -1, 1, 1)
    if slope is not None:
        y = jnp.where(y >= 0, y, slope * y)
    return y


def lab_discriminator_reference(params, x):
    out = _ref_conv(x, params["conv1_w"], params["conv1_b"], 1, 1, _LEAKY_SLOPE)
    out = _ref_conv(out, params["conv2_w"], params["conv2_b"], 2, 1, _LEAKY_SLOPE)
    out = _ref_conv(out, params["conv3_w"], params["conv3_b"], 1, 1, _LEAKY_SLOPE)
    out = _ref_conv(out, params["conv4_w"], params["conv4_b"], 2, 1, None)
    flat = out.reshape(out.shape[0], -1)
    return (flat @ params["fc_w"] + params["fc_b"]).reshape(-1)


if __name__ == "__main__":
    # batch=2, local_nlabels=4 (label channels), ndf=16, 8x8 input so that two
    # stride-2 convs land on final_res == 2, exactly as the PyTorch module expects.
    batch, local_nlabels, ndf, size = 2, 4, 16, 8

    key = jax.random.PRNGKey(0)
    k_x, k_p = jax.random.split(key)
    x = jax.random.normal(k_x, (batch, local_nlabels, size, size), jnp.float32)
    params = init_params(k_p, local_nlabels, ndf)

    fused = prepare_fused_params(params, size)          # one-time weight prep
    out = jax.block_until_ready(lab_discriminator_forward(fused, x))

    ref = lab_discriminator_reference(params, x)
    assert out.shape == (batch,), out.shape
    assert jnp.allclose(out, ref, atol=1e-4, rtol=1e-4), (out, ref)

    print("KERNEL_OK")
</pallas_src>

<mosaic_0001>
module attributes {stable_mosaic.version = 11 : i64} {
  func.func @_fused_lab_disc_kernel(%arg0: i32, %arg1: memref<2x256xf32, #tpu.memory_space<vmem>>, %arg2: memref<256x1024xf32, #tpu.memory_space<vmem>>, %arg3: memref<1x1024xf32, #tpu.memory_space<vmem>>, %arg4: memref<1024x256xf32, #tpu.memory_space<vmem>>, %arg5: memref<1x256xf32, #tpu.memory_space<vmem>>, %arg6: memref<256x512xf32, #tpu.memory_space<vmem>>, %arg7: memref<1x512xf32, #tpu.memory_space<vmem>>, %arg8: memref<512x128xf32, #tpu.memory_space<vmem>>, %arg9: memref<1x128xf32, #tpu.memory_space<vmem>>, %arg10: memref<128x1xf32, #tpu.memory_space<vmem>>, %arg11: memref<1x1xf32, #tpu.memory_space<vmem>>, %arg12: memref<2x1xf32, #tpu.memory_space<vmem>>) attributes {dimension_semantics = [#tpu.dimension_semantics<arbitrary>], iteration_bounds = array<i64: 1>, scalar_prefetch = 0 : i64, scratch_operands = 0 : i64, tpu.core_type = #tpu.core_type<tc>, window_params = [{pipeline_mode = #tpu.pipeline_mode<synchronous>, transform_indices = @transform_0, window_bounds = array<i64: 2, 256>}, {pipeline_mode = #tpu.pipeline_mode<synchronous>, transform_indices = @transform_1, window_bounds = array<i64: 256, 1024>}, {pipeline_mode = #tpu.pipeline_mode<synchronous>, transform_indices = @transform_2, window_bounds = array<i64: 1, 1024>}, {pipeline_mode = #tpu.pipeline_mode<synchronous>, transform_indices = @transform_3, window_bounds = array<i64: 1024, 256>}, {pipeline_mode = #tpu.pipeline_mode<synchronous>, transform_indices = @transform_4, window_bounds = array<i64: 1, 256>}, {pipeline_mode = #tpu.pipeline_mode<synchronous>, transform_indices = @transform_5, window_bounds = array<i64: 256, 512>}, {pipeline_mode = #tpu.pipeline_mode<synchronous>, transform_indices = @transform_6, window_bounds = array<i64: 1, 512>}, {pipeline_mode = #tpu.pipeline_mode<synchronous>, transform_indices = @transform_7, window_bounds = array<i64: 512, 128>}, {pipeline_mode = #tpu.pipeline_mode<synchronous>, transform_indices = @transform_8, window_bounds = array<i64: 1, 128>}, {pipeline_mode = #tpu.pipeline_mode<synchronous>, transform_indices = @transform_9, window_bounds = array<i64: 128, 1>}, {pipeline_mode = #tpu.pipeline_mode<synchronous>, transform_indices = @transform_10, window_bounds = array<i64: 1, 1>}, {pipeline_mode = #tpu.pipeline_mode<synchronous>, transform_indices = @transform_11, window_bounds = array<i64: 2, 1>}]} {
    %c0 = arith.constant 0 : index
    %c0_0 = arith.constant 0 : index
    %0 = vector.load %arg1[%c0, %c0_0] : memref<2x256xf32, #tpu.memory_space<vmem>>, vector<2x256xf32>
    %c0_1 = arith.constant 0 : index
    %c0_2 = arith.constant 0 : index
    %1 = vector.load %arg2[%c0_1, %c0_2] : memref<256x1024xf32, #tpu.memory_space<vmem>>, vector<256x1024xf32>
    %cst = arith.constant dense<0.000000e+00> : vector<2x1024xf32>
    %2 = tpu.matmul %0, %1, %cst {dimension_numbers = #tpu.dot_dimension_numbers<[1], [0], [0], [1], [0, 0, 1, 1], [], []>} : vector<2x256xf32>, vector<256x1024xf32>, vector<2x1024xf32> -> vector<2x1024xf32>
    %c0_3 = arith.constant 0 : index
    %c0_4 = arith.constant 0 : index
    %3 = vector.load %arg3[%c0_3, %c0_4] : memref<1x1024xf32, #tpu.memory_space<vmem>>, vector<1x1024xf32>
    %4 = vector.broadcast %3 : vector<1x1024xf32> to vector<2x1024xf32>
    %5 = arith.addf %2, %4 : vector<2x1024xf32>
    %cst_5 = arith.constant 0.000000e+00 : f32
    %6 = vector.broadcast %cst_5 : f32 to vector<2x1024xf32>
    %7 = arith.cmpf oge, %5, %6 : vector<2x1024xf32>
    %cst_6 = arith.constant 2.000000e-01 : f32
    %8 = vector.broadcast %cst_6 : f32 to vector<2x1024xf32>
    %9 = arith.mulf %8, %5 : vector<2x1024xf32>
    %10 = arith.select %7, %5, %9 : vector<2x1024xi1>, vector<2x1024xf32>
    %c0_7 = arith.constant 0 : index
    %c0_8 = arith.constant 0 : index
    %11 = vector.load %arg4[%c0_7, %c0_8] : memref<1024x256xf32, #tpu.memory_space<vmem>>, vector<1024x256xf32>
    %cst_9 = arith.constant dense<0.000000e+00> : vector<2x256xf32>
    %12 = tpu.matmul %10, %11, %cst_9 {dimension_numbers = #tpu.dot_dimension_numbers<[1], [0], [0], [1], [0, 0, 1, 1], [], []>} : vector<2x1024xf32>, vector<1024x256xf32>, vector<2x256xf32> -> vector<2x256xf32>
    %c0_10 = arith.constant 0 : index
    %c0_11 = arith.constant 0 : index
    %13 = vector.load %arg5[%c0_10, %c0_11] : memref<1x256xf32, #tpu.memory_space<vmem>>, vector<1x256xf32>
    %14 = vector.broadcast %13 : vector<1x256xf32> to vector<2x256xf32>
    %15 = arith.addf %12, %14 : vector<2x256xf32>
    %cst_12 = arith.constant 0.000000e+00 : f32
    %16 = vector.broadcast %cst_12 : f32 to vector<2x256xf32>
    %17 = arith.cmpf oge, %15, %16 : vector<2x256xf32>
    %cst_13 = arith.constant 2.000000e-01 : f32
    %18 = vector.broadcast %cst_13 : f32 to vector<2x256xf32>
    %19 = arith.mulf %18, %15 : vector<2x256xf32>
    %20 = arith.select %17, %15, %19 : vector<2x256xi1>, vector<2x256xf32>
    %c0_14 = arith.constant 0 : index
    %c0_15 = arith.constant 0 : index
    %21 = vector.load %arg6[%c0_14, %c0_15] : memref<256x512xf32, #tpu.memory_space<vmem>>, vector<256x512xf32>
    %cst_16 = arith.constant dense<0.000000e+00> : vector<2x512xf32>
    %22 = tpu.matmul %20, %21, %cst_16 {dimension_numbers = #tpu.dot_dimension_numbers<[1], [0], [0], [1], [0, 0, 1, 1], [], []>} : vector<2x256xf32>, vector<256x512xf32>, vector<2x512xf32> -> vector<2x512xf32>
    %c0_17 = arith.constant 0 : index
    %c0_18 = arith.constant 0 : index
    %23 = vector.load %arg7[%c0_17, %c0_18] : memref<1x512xf32, #tpu.memory_space<vmem>>, vector<1x512xf32>
    %24 = vector.broadcast %23 : vector<1x512xf32> to vector<2x512xf32>
    %25 = arith.addf %22, %24 : vector<2x512xf32>
    %cst_19 = arith.constant 0.000000e+00 : f32
    %26 = vector.broadcast %cst_19 : f32 to vector<2x512xf32>
    %27 = arith.cmpf oge, %25, %26 : vector<2x512xf32>
    %cst_20 = arith.constant 2.000000e-01 : f32
    %28 = vector.broadcast %cst_20 : f32 to vector<2x512xf32>
    %29 = arith.mulf %28, %25 : vector<2x512xf32>
    %30 = arith.select %27, %25, %29 : vector<2x512xi1>, vector<2x512xf32>
    %c0_21 = arith.constant 0 : index
    %c0_22 = arith.constant 0 : index
    %31 = vector.load %arg8[%c0_21, %c0_22] : memref<512x128xf32, #tpu.memory_space<vmem>>, vector<512x128xf32>
    %cst_23 = arith.constant dense<0.000000e+00> : vector<2x128xf32>
    %32 = tpu.matmul %30, %31, %cst_23 {dimension_numbers = #tpu.dot_dimension_numbers<[1], [0], [0], [1], [0, 0, 1, 1], [], []>} : vector<2x512xf32>, vector<512x128xf32>, vector<2x128xf32> -> vector<2x128xf32>
    %c0_24 = arith.constant 0 : index
    %c0_25 = arith.constant 0 : index
    %33 = vector.load %arg9[%c0_24, %c0_25] : memref<1x128xf32, #tpu.memory_space<vmem>>, vector<1x128xf32>
    %34 = vector.broadcast %33 : vector<1x128xf32> to vector<2x128xf32>
    %35 = arith.addf %32, %34 : vector<2x128xf32>
    %c0_26 = arith.constant 0 : index
    %c0_27 = arith.constant 0 : index
    %36 = vector.load %arg10[%c0_26, %c0_27] : memref<128x1xf32, #tpu.memory_space<vmem>>, vector<128x1xf32>
    %cst_28 = arith.constant dense<0.000000e+00> : vector<2x1xf32>
    %37 = tpu.matmul %35, %36, %cst_28 {dimension_numbers = #tpu.dot_dimension_numbers<[1], [0], [0], [1], [0, 0, 1, 1], [], []>} : vector<2x128xf32>, vector<128x1xf32>, vector<2x1xf32> -> vector<2x1xf32>
    %c0_29 = arith.constant 0 : index
    %c0_30 = arith.constant 0 : index
    %38 = vector.load %arg11[%c0_29, %c0_30] : memref<1x1xf32, #tpu.memory_space<vmem>>, vector<1x1xf32>
    %39 = vector.broadcast %38 : vector<1x1xf32> to vector<2x1xf32>
    %40 = arith.addf %37, %39 : vector<2x1xf32>
    %c0_31 = arith.constant 0 : index
    %c0_32 = arith.constant 0 : index
    %41 = vector.load %arg12[%c0_31, %c0_32] : memref<2x1xf32, #tpu.memory_space<vmem>>, vector<2x1xf32>
    tpu.vector_store %arg12[%c0_31, %c0_32], %40 {strides = array<i32>} : memref<2x1xf32, #tpu.memory_space<vmem>>, vector<2x1xf32>,
    return
  }
  func.func @transform_0(%arg0: i32) -> (i32, i32) {
    %c0_i32 = arith.constant 0 : i32
    %c0_i32_0 = arith.constant 0 : i32
    %c0_i32_1 = arith.constant 0 : i32
    return %c0_i32, %c0_i32_0 : i32, i32
  }
  func.func @transform_1(%arg0: i32) -> (i32, i32) {
    %c0_i32 = arith.constant 0 : i32
    %c0_i32_0 = arith.constant 0 : i32
    %c0_i32_1 = arith.constant 0 : i32
    return %c0_i32, %c0_i32_0 : i32, i32
  }
  func.func @transform_2(%arg0: i32) -> (i32, i32) {
    %c0_i32 = arith.constant 0 : i32
    %c0_i32_0 = arith.constant 0 : i32
    %c0_i32_1 = arith.constant 0 : i32
    return %c0_i32, %c0_i32_0 : i32, i32
  }
  func.func @transform_3(%arg0: i32) -> (i32, i32) {
    %c0_i32 = arith.constant 0 : i32
    %c0_i32_0 = arith.constant 0 : i32
    %c0_i32_1 = arith.constant 0 : i32
    return %c0_i32, %c0_i32_0 : i32, i32
  }
  func.func @transform_4(%arg0: i32) -> (i32, i32) {
    %c0_i32 = arith.constant 0 : i32
    %c0_i32_0 = arith.constant 0 : i32
    %c0_i32_1 = arith.constant 0 : i32
    return %c0_i32, %c0_i32_0 : i32, i32
  }
  func.func @transform_5(%arg0: i32) -> (i32, i32) {
    %c0_i32 = arith.constant 0 : i32
    %c0_i32_0 = arith.constant 0 : i32
    %c0_i32_1 = arith.constant 0 : i32
    return %c0_i32, %c0_i32_0 : i32, i32
  }
  func.func @transform_6(%arg0: i32) -> (i32, i32) {
    %c0_i32 = arith.constant 0 : i32
    %c0_i32_0 = arith.constant 0 : i32
    %c0_i32_1 = arith.constant 0 : i32
    return %c0_i32, %c0_i32_0 : i32, i32
  }
  func.func @transform_7(%arg0: i32) -> (i32, i32) {
    %c0_i32 = arith.constant 0 : i32
    %c0_i32_0 = arith.constant 0 : i32
    %c0_i32_1 = arith.constant 0 : i32
    return %c0_i32, %c0_i32_0 : i32, i32
  }
  func.func @transform_8(%arg0: i32) -> (i32, i32) {
    %c0_i32 = arith.constant 0 : i32
    %c0_i32_0 = arith.constant 0 : i32
    %c0_i32_1 = arith.constant 0 : i32
    return %c0_i32, %c0_i32_0 : i32, i32
  }
  func.func @transform_9(%arg0: i32) -> (i32, i32) {
    %c0_i32 = arith.constant 0 : i32
    %c0_i32_0 = arith.constant 0 : i32
    %c0_i32_1 = arith.constant 0 : i32
    return %c0_i32, %c0_i32_0 : i32, i32
  }
  func.func @transform_10(%arg0: i32) -> (i32, i32) {
    %c0_i32 = arith.constant 0 : i32
    %c0_i32_0 = arith.constant 0 : i32
    %c0_i32_1 = arith.constant 0 : i32
    return %c0_i32, %c0_i32_0 : i32, i32
  }
  func.func @transform_11(%arg0: i32) -> (i32, i32) {
    %c0_i32 = arith.constant 0 : i32
    %c0_i32_0 = arith.constant 0 : i32
    %c0_i32_1 = arith.constant 0 : i32
    return %c0_i32, %c0_i32_0 : i32, i32
  }
}

</mosaic_0001>

<bundles_post_ra>
// kernel: tpu_custom_call.1
= control target key start
LH: loop header
LB: loop body
LE: loop exit
PB: predicated region body
PF: predicated region fallthrough
CT: control target
= control target key end

     0   :  { %s3130_s0 = inlined_call_operand.vmem [shape: f32[2,256], index: 0, kind: input, shape index: {}]   ;;  %s3131_s1 = inlined_call_operand.hbm [shape: f32[256,1024], index: 1, kind: input, shape index: {}]   ;;  %s3132_s2 = inlined_call_operand.vmem [shape: f32[1,1024], index: 2, kind: input, shape index: {}]   ;;  %s3133_s3 = inlined_call_operand.hbm [shape: f32[1024,256], index: 3, kind: input, shape index: {}]   ;;  %s3134_s4 = inlined_call_operand.vmem [shape: f32[1,256], index: 4, kind: input, shape index: {}]   ;;  %s3135_s5 = inlined_call_operand.hbm [shape: f32[256,512], index: 5, kind: input, shape index: {}]   ;;  %s3136_s6 = inlined_call_operand.vmem [shape: f32[1,512], index: 6, kind: input, shape index: {}]   ;;  %s3137_s7 = inlined_call_operand.hbm [shape: f32[512,128], index: 7, kind: input, shape index: {}]   ;;  %s3138_s8 = inlined_call_operand.vmem [shape: f32[1,128], index: 8, kind: input, shape index: {}]   ;;  %s3139_s9 = inlined_call_operand.vmem [shape: f32[128,1], index: 9, kind: input, shape index: {}]   ;;  %s3140_s10 = inlined_call_operand.<no memory space> [shape: f32[1,1], index: 10, kind: input, shape index: {}]   ;;  %s3141_s11 = inlined_call_operand.vmem [shape: f32[2,1], index: 11, kind: output, shape index: {}]  }
   0x1   :  { %v16_v0 = vstv %s3140_s10 }
   0x2   :  { %17 = vst [vmem:[#allocation2] sm:$0x1] %v16_v0 }
   0x3   :  { %18 = vsyncpa [#allocation4], 0 }
   0x4   :  { %19 = vsyncpa [#allocation6], 0 }
   0x5   :  { %20 = vsyncpa [#allocation9], 0  ;;  %s2860_s19 = smov [#allocation5]   ;;  %s2766_s23 = scalar_lea.hbm %s3133_s3, 32768 }
   0x6   :  { %s42_s20 = sshll.u32 %s2860_s19, 4  ;;  %p2767_p0 = scmp.ne.s32.totalorder %s3133_s3, %s2766_s23  ;;  %s43_s20 = int_to_ptr.vmem [resolvable:$true] %s42_s20 }
   0x7   :  { %p2770_p1 = scmp.lt.u32.totalorder %s2766_s23, %s3133_s3 }
   0x9   :  { %p2772_p2 = pnand %p2770_p1, %p2767_p0 }
   0xb   :  { %2775 = shalt.err (!%p2772_p2)
}
   0xc   :  { %s2776_s10 = scalar_lea.vmem %s43_s20, 32768  ;;  %p2781_p4 = scmp.lt.s32.totalorder %s43_s20, %s43_s20 }
   0xd   :  { %p2777_p3 = scmp.ne.s32.totalorder %s43_s20, %s2776_s10  ;;  %p2782_p5 = scmp.lt.s32.totalorder %s2776_s10, %s2776_s10 }
   0xf   :  { %p2783_p6 = por %p2782_p5, %p2781_p4 }
  0x11   :  { %p2784_p7 = pnand %p2783_p6, %p2777_p3 }
  0x13   :  { %2787 = shalt.err (!%p2784_p7)
}
  0x14   :  { %s2861_s28 = smov 256   ;;  %s2862_s29 = smov 16  }
  0x15   :  { %48 = dma.hbm_to_vmem [thread:$0]  %s3133_s3, 32768, %s43_s20, [#allocation6], %s2861_s28, %s2861_s28, %s2862_s29  }
  0x16   :  { %s2863_s13 = smov [#allocation3]   ;;  %s2788_s17 = scalar_lea.hbm %s3131_s1, 32768 }
  0x17   :  { %s28_s14 = sshll.u32 %s2863_s13, 4  ;;  %p2789_p8 = scmp.ne.s32.totalorder %s3131_s1, %s2788_s17  ;;  %s29_s14 = int_to_ptr.vmem [resolvable:$true] %s28_s14 }
  0x18   :  { %p2792_p9 = scmp.lt.u32.totalorder %s2788_s17, %s3131_s1 }
  0x1a   :  { %p2794_p10 = pnand %p2792_p9, %p2789_p8 }
  0x1c   :  { %2797 = shalt.err (!%p2794_p10)
}
  0x1d   :  { %s2798_s23 = scalar_lea.vmem %s29_s14, 32768  ;;  %p2803_p12 = scmp.lt.s32.totalorder %s29_s14, %s29_s14 }
  0x1e   :  { %p2799_p11 = scmp.ne.s32.totalorder %s29_s14, %s2798_s23  ;;  %p2804_p13 = scmp.lt.s32.totalorder %s2798_s23, %s2798_s23 }
  0x20   :  { %p2805_p0 = por %p2804_p13, %p2803_p12 }
  0x22   :  { %p2806_p1 = pnand %p2805_p0, %p2799_p11 }
  0x24   :  { %2809 = shalt.err (!%p2806_p1)
}
  0x25   :  { %s2864_s3 = smov 1024   ;;  %s2865_s20 = smov 64  }
  0x26   :  { %34 = dma.hbm_to_vmem [thread:$0]  %s3131_s1, 32768, %s29_s14, [#allocation4], %s2864_s3, %s2864_s3, %s2865_s20  }
  0x27   :  { %s2866_s26 = smov [#allocation7]   ;;  %s2810_s29 = scalar_lea.hbm %s3135_s5, 16384 }
  0x28   :  { %s56_s27 = sshll.u32 %s2866_s26, 4  ;;  %p2811_p2 = scmp.ne.s32.totalorder %s3135_s5, %s2810_s29  ;;  %s57_s27 = int_to_ptr.vmem [resolvable:$true] %s56_s27 }
  0x29   :  { %p2814_p3 = scmp.lt.u32.totalorder %s2810_s29, %s3135_s5 }
  0x2b   :  { %p2816_p4 = pnand %p2814_p3, %p2811_p2 }
  0x2d   :  { %2819 = shalt.err (!%p2816_p4)
}
  0x2e   :  { %s2820_s16 = scalar_lea.vmem %s57_s27, 16384  ;;  %p2825_p6 = scmp.lt.s32.totalorder %s57_s27, %s57_s27 }
  0x2f   :  { %p2821_p5 = scmp.ne.s32.totalorder %s57_s27, %s2820_s16  ;;  %p2826_p7 = scmp.lt.s32.totalorder %s2820_s16, %s2820_s16 }
  0x31   :  { %p2827_p8 = por %p2826_p7, %p2825_p6 }
  0x33   :  { %p2828_p9 = pnand %p2827_p8, %p2821_p5 }
  0x35   :  { %2831 = shalt.err (!%p2828_p9)
}
  0x36   :  { %s2867_s1 = smov 512   ;;  %s2868_s14 = smov 32  }
  0x37   :  { %62 = dma.hbm_to_vmem [thread:$0]  %s3135_s5, 16384, %s57_s27, [#allocation6], %s2867_s1, %s2867_s1, %s2868_s14  }
  0x38   :  { %s2869_s19 = smov [#allocation8]   ;;  %s2832_s3 = scalar_lea.hbm %s3137_s7, 8192 }
  0x39   :  { %s70_s21 = sshll.u32 %s2869_s19, 4  ;;  %p2833_p10 = scmp.ne.s32.totalorder %s3137_s7, %s2832_s3  ;;  %s71_s21 = int_to_ptr.vmem [resolvable:$true] %s70_s21 }
  0x3a   :  { %p2836_p11 = scmp.lt.u32.totalorder %s2832_s3, %s3137_s7 }
  0x3c   :  { %p2838_p12 = pnand %p2836_p11, %p2833_p10 }
  0x3e   :  { %2841 = shalt.err (!%p2838_p12)
}
  0x3f   :  { %s2842_s10 = scalar_lea.vmem %s71_s21, 8192  ;;  %p2847_p0 = scmp.lt.s32.totalorder %s71_s21, %s71_s21 }
  0x40   :  { %p2843_p13 = scmp.ne.s32.totalorder %s71_s21, %s2842_s10  ;;  %p2848_p1 = scmp.lt.s32.totalorder %s2842_s10, %s2842_s10 }
  0x42   :  { %p2849_p2 = por %p2848_p1, %p2847_p0 }
  0x44   :  { %p2850_p3 = pnand %p2849_p2, %p2843_p13 }
  0x46   :  { %2853 = shalt.err (!%p2850_p3)
}
  0x47   :  { %s2870_s5 = smov 128   ;;  %s2871_s27 = smov 8  }
  0x48   :  { %76 = dma.hbm_to_vmem [thread:$0]  %s3137_s7, 8192, %s71_s21, [#allocation9], %s2870_s5, %s2870_s5, %s2871_s27  }
  0x49   :  { %2854 = dma.done.wait [#allocation4], 32768  }
  0x4a   :  { %2855 = vsyncadd [#allocation4], 4294934528 }
  0x4b   :  { %2856 = dma.done.wait [#allocation6], 49152  }
  0x4c   :  { %2857 = vsyncadd [#allocation6], 4294918144 }
  0x4d   :  { %2858 = dma.done.wait [#allocation9], 8192  }
  0x4e   :  { %2859 = vsyncadd [#allocation9], 4294959104  ;;  %v97_v1 = vld [vmem:[#allocation3 + $0x8] sm:$0xff]  ;;  %v96_v3 = vld [vmem:[#allocation3] sm:$0xff]  ;;  %vm2873_vm14 = vmmov 0   ;;  %vm1879_vm15 = vcmask 1024  }
  0x4f   :  { %v105_v2 = vld [vmem:[#allocation3 + $0x48] sm:$0xff]  ;;  %v104_v5 = vld [vmem:[#allocation3 + $0x40] sm:$0xff]  ;;  %v99_v44 = vld [vmem:[#allocation3 + $0x18] sm:$0xff] }
  0x50   :  { %v2013_v4 = vpack.c.bf16 %v105_v2, %v97_v1  ;;  %v113_v6 = vld [vmem:[#allocation3 + $0x88] sm:$0xff]  ;;  %v2015_v8 = vpack.c.bf16 %v104_v5, %v96_v3  ;;  %v112_v10 = vld [vmem:[#allocation3 + $0x80] sm:$0xff]  ;;  %v107_v45 = vld [vmem:[#allocation3 + $0x58] sm:$0xff] }
  0x51   :  { %v121_v7 = vld [vmem:[#allocation3 + $0xc8] sm:$0xff]  ;;  %v120_v11 = vld [vmem:[#allocation3 + $0xc0] sm:$0xff]  ;;  %v2077_v46 = vpack.c.bf16 %v107_v45, %v99_v44  ;;  %v98_v47 = vld [vmem:[#allocation3 + $0x10] sm:$0xff] }
  0x52   :  { %v2017_v9 = vpack.c.bf16 %v121_v7, %v113_v6  ;;  %v129_v12 = vld [vmem:[#allocation3 + $0x108] sm:$0xff]  ;;  %2014 = vmatprep.subr.bf16.mxu0 %v2013_v4  ;;  %v2019_v14 = vpack.c.bf16 %v120_v11, %v112_v10  ;;  %v128_v16 = vld [vmem:[#allocation3 + $0x100] sm:$0xff]  ;;  %v106_v48 = vld [vmem:[#allocation3 + $0x50] sm:$0xff] }
  0x53   :  { %v137_v13 = vld [vmem:[#allocation3 + $0x148] sm:$0xff]  ;;  %2016 = vmatpush1.bf16.msra.mxu0 %v2015_v8  ;;  %v136_v17 = vld [vmem:[#allocation3 + $0x140] sm:$0xff]  ;;  %v2079_v50 = vpack.c.bf16 %v106_v48, %v98_v47  ;;  %v115_v52 = vld [vmem:[#allocation3 + $0x98] sm:$0xff]  ;;  %2078 = vmatprep.subr.bf16.mxu1 %v2077_v46 }
  0x54   :  { %2018 = vmatprep.subr.bf16.mxu0 %v2017_v9  ;;  %v2021_v15 = vpack.c.bf16 %v137_v13, %v129_v12  ;;  %v145_v18 = vld [vmem:[#allocation3 + $0x188] sm:$0xff]  ;;  %v2023_v20 = vpack.c.bf16 %v136_v17, %v128_v16  ;;  %v144_v22 = vld [vmem:[#allocation3 + $0x180] sm:$0xff]  ;;  %v123_v53 = vld [vmem:[#allocation3 + $0xd8] sm:$0xff] }
  0x55   :  { %v153_v19 = vld [vmem:[#allocation3 + $0x1c8] sm:$0xff]  ;;  %v152_v23 = vld [vmem:[#allocation3 + $0x1c0] sm:$0xff]  ;;  %v114_v54 = vld [vmem:[#allocation3 + $0x90] sm:$0xff]  ;;  %v2081_v56 = vpack.c.bf16 %v123_v53, %v115_v52  ;;  %2080 = vmatpush1.bf16.msra.mxu1 %v2079_v50 }
  0x56   :  { %v2025_v21 = vpack.c.bf16 %v153_v19, %v145_v18  ;;  %v161_v24 = vld [vmem:[#allocation3 + $0x208] sm:$0xff]  ;;  %v2027_v26 = vpack.c.bf16 %v152_v23, %v144_v22  ;;  %v160_v28 = vld [vmem:[#allocation3 + $0x200] sm:$0xff]  ;;  %v122_v57 = vld [vmem:[#allocation3 + $0xd0] sm:$0xff] }
  0x57   :  { %2020 = vmatpush1.bf16.msra.mxu0 %v2019_v14  ;;  %v169_v25 = vld [vmem:[#allocation3 + $0x248] sm:$0xff]  ;;  %v168_v29 = vld [vmem:[#allocation3 + $0x240] sm:$0xff]  ;;  %v131_v58 = vld [vmem:[#allocation3 + $0x118] sm:$0xff]  ;;  %v2083_v0 = vpack.c.bf16 %v122_v57, %v114_v54  ;;  %2082 = vmatprep.subr.bf16.mxu1 %v2081_v56 }
  0x58   :  { %2022 = vmatprep.subr.bf16.mxu0 %v2021_v15  ;;  %v2029_v27 = vpack.c.bf16 %v169_v25, %v161_v24  ;;  %v177_v30 = vld [vmem:[#allocation3 + $0x288] sm:$0xff]  ;;  %v2031_v32 = vpack.c.bf16 %v168_v29, %v160_v28  ;;  %v176_v34 = vld [vmem:[#allocation3 + $0x280] sm:$0xff]  ;;  %v139_v59 = vld [vmem:[#allocation3 + $0x158] sm:$0xff] }
  0x59   :  { %v185_v31 = vld [vmem:[#allocation3 + $0x2c8] sm:$0xff]  ;;  %v184_v35 = vld [vmem:[#allocation3 + $0x2c0] sm:$0xff]  ;;  %v2085_v2 = vpack.c.bf16 %v139_v59, %v131_v58  ;;  %v130_v3 = vld [vmem:[#allocation3 + $0x110] sm:$0xff]  ;;  %2084 = vmatpush1.bf16.msra.mxu1 %v2083_v0 }
  0x5a   :  { %v2033_v33 = vpack.c.bf16 %v185_v31, %v177_v30  ;;  %v193_v36 = vld [vmem:[#allocation3 + $0x308] sm:$0xff]  ;;  %v2035_v38 = vpack.c.bf16 %v184_v35, %v176_v34  ;;  %v192_v39 = vld [vmem:[#allocation3 + $0x300] sm:$0xff]  ;;  %v138_v4 = vld [vmem:[#allocation3 + $0x150] sm:$0xff] }
  0x5b   :  { %2024 = vmatpush1.bf16.msra.mxu0 %v2023_v20  ;;  %v201_v37 = vld [vmem:[#allocation3 + $0x348] sm:$0xff]  ;;  %v200_v40 = vld [vmem:[#allocation3 + $0x340] sm:$0xff]  ;;  %v147_v5 = vld [vmem:[#allocation3 + $0x198] sm:$0xff]  ;;  %v2087_v12 = vpack.c.bf16 %v138_v4, %v130_v3  ;;  %2086 = vmatprep.subr.bf16.mxu1 %v2085_v2 }
  0x5c   :  { %2026 = vmatprep.subr.bf16.mxu0 %v2025_v21  ;;  %v209_v41 = vld [vmem:[#allocation3 + $0x388] sm:$0xff]  ;;  %v2037_v42 = vpack.c.bf16 %v201_v37, %v193_v36  ;;  %v2989_v49 = vld.sshfl [vmem:[%s3130_s0] sm:$0x33 pattern:$0x76325410]  ;;  %v2039_v55 = vpack.c.bf16 %v200_v40, %v192_v39  ;;  %v146_v15 = vld [vmem:[#allocation3 + $0x190] sm:$0xff] }
  0x5d   :  { %v217_v43 = vld [vmem:[#allocation3 + $0x3c8] sm:$0xff]  ;;  %v2993_v51 = vcombine.high %v2989_v49, %v2989_v49  ;;  %v208_v61 = vld [vmem:[#allocation3 + $0x380] sm:$0xff]  ;;  %v155_v6 = vld [vmem:[#allocation3 + $0x1d8] sm:$0xff]  ;;  %2088 = vmatpush1.bf16.msra.mxu1 %v2087_v12 }
  0x5e   :  { %v2041_v60 = vpack.c.bf16 %v217_v43, %v209_v41  ;;  %v216_v62 = vld [vmem:[#allocation3 + $0x3c0] sm:$0xff]  ;;  %v225_v63 = vld [vmem:[#allocation3 + $0x408] sm:$0xff]  ;;  %v2089_v14 = vpack.c.bf16 %v155_v6, %v147_v5  ;;  %v154_v16 = vld [vmem:[#allocation3 + $0x1d0] sm:$0xff] }
  0x5f   :  { %2028 = vmatpush1.bf16.msra.mxu0 %v2027_v26  ;;  %v233_v1 = vld [vmem:[#allocation3 + $0x448] sm:$0xff]  ;;  %469 = vmatprep.mubr.f32.mxu0 %v2993_v51  ;;  %v2043_v7 = vpack.c.bf16 %v216_v62, %v208_v61  ;;  %v224_v9 = vld [vmem:[#allocation3 + $0x400] sm:$0xff]  ;;  %v163_v17 = vld [vmem:[#allocation3 + $0x218] sm:$0xff]  ;;  %v2091_v24 = vpack.c.bf16 %v154_v16, %v146_v15 }
  0x60   :  { %2030 = vmatprep.subr.bf16.mxu0 %v2029_v27  ;;  %540 = vmatprep.mubr.f32.mxu1 %v2993_v51  ;;  %v2045_v8 = vpack.c.bf16 %v233_v1, %v225_v63  ;;  %v232_v10 = vld [vmem:[#allocation3 + $0x440] sm:$0xff]  ;;  %v241_v11 = vld [vmem:[#allocation3 + $0x488] sm:$0xff]  ;;  %v171_v18 = vld [vmem:[#allocation3 + $0x258] sm:$0xff] }
  0x61   :  { %v249_v13 = vld [vmem:[#allocation3 + $0x4c8] sm:$0xff]  ;;  %v2047_v19 = vpack.c.bf16 %v232_v10, %v224_v9  ;;  %v240_v21 = vld [vmem:[#allocation3 + $0x480] sm:$0xff]  ;;  %2090 = vmatprep.subr.bf16.mxu1 %v2089_v14  ;;  %v2093_v26 = vpack.c.bf16 %v171_v18, %v163_v17  ;;  %v162_v27 = vld [vmem:[#allocation3 + $0x210] sm:$0xff] }
  0x62   :  { %v2049_v20 = vpack.c.bf16 %v249_v13, %v241_v11  ;;  %v248_v22 = vld [vmem:[#allocation3 + $0x4c0] sm:$0xff]  ;;  %v257_v23 = vld [vmem:[#allocation3 + $0x508] sm:$0xff]  ;;  %v170_v28 = vld [vmem:[#allocation3 + $0x250] sm:$0xff]  ;;  %2092 = vmatpush1.bf16.msra.mxu1 %v2091_v24 }
  0x63   :  { %2032 = vmatpush1.bf16.msra.mxu0 %v2031_v32  ;;  %v265_v25 = vld [vmem:[#allocation3 + $0x548] sm:$0xff]  ;;  %v179_v29 = vld [vmem:[#allocation3 + $0x298] sm:$0xff]  ;;  %v2051_v31 = vpack.c.bf16 %v248_v22, %v240_v21  ;;  %v264_v34 = vld [vmem:[#allocation3 + $0x540] sm:$0xff]  ;;  %v2095_v36 = vpack.c.bf16 %v170_v28, %v162_v27  ;;  %2094 = vmatprep.subr.bf16.mxu1 %v2093_v26 }
  0x64   :  { %2034 = vmatprep.subr.bf16.mxu0 %v2033_v33  ;;  %v187_v30 = vld [vmem:[#allocation3 + $0x2d8] sm:$0xff]  ;;  %v2053_v32 = vpack.c.bf16 %v265_v25, %v257_v23  ;;  %v256_v33 = vld [vmem:[#allocation3 + $0x500] sm:$0xff]  ;;  %v273_v35 = vld [vmem:[#allocation3 + $0x588] sm:$0xff] }
  0x65   :  { %v281_v37 = vld [vmem:[#allocation3 + $0x5c8] sm:$0xff]  ;;  %v178_v39 = vld [vmem:[#allocation3 + $0x290] sm:$0xff]  ;;  %v195_v41 = vld [vmem:[#allocation3 + $0x318] sm:$0xff]  ;;  %v2055_v43 = vpack.c.bf16 %v264_v34, %v256_v33 }
  0x66   :  { %v186_v40 = vld [vmem:[#allocation3 + $0x2d0] sm:$0xff]  ;;  %v2057_v44 = vpack.c.bf16 %v281_v37, %v273_v35  ;;  %v272_v45 = vld [vmem:[#allocation3 + $0x580] sm:$0xff]  ;;  %v289_v47 = vld [vmem:[#allocation3 + $0x608] sm:$0xff]  ;;  %2096 = vmatpush1.bf16.msra.mxu1 %v2095_v36 }
  0x67   :  { %2036 = vmatpush1.bf16.msra.mxu0 %v2035_v38  ;;  %v2097_v38 = vpack.c.bf16 %v187_v30, %v179_v29  ;;  %v280_v46 = vld [vmem:[#allocation3 + $0x5c0] sm:$0xff]  ;;  %v2099_v48 = vpack.c.bf16 %v186_v40, %v178_v39  ;;  %v297_v50 = vld [vmem:[#allocation3 + $0x648] sm:$0xff]  ;;  %v194_v53 = vld [vmem:[#allocation3 + $0x310] sm:$0xff] }
  0x68   :  { %2038 = vmatprep.subr.bf16.mxu0 %v2037_v42  ;;  %v203_v42 = vld [vmem:[#allocation3 + $0x358] sm:$0xff]  ;;  %v202_v54 = vld [vmem:[#allocation3 + $0x350] sm:$0xff]  ;;  %v2059_v57 = vpack.c.bf16 %v280_v46, %v272_v45  ;;  %v2061_v58 = vpack.c.bf16 %v297_v50, %v289_v47  ;;  %v288_v59 = vld [vmem:[#allocation3 + $0x600] sm:$0xff] }
  0x69   :  { %2098 = vmatprep.subr.bf16.mxu1 %v2097_v38  ;;  %v2101_v52 = vpack.c.bf16 %v203_v42, %v195_v41  ;;  %v219_v56 = vld [vmem:[#allocation3 + $0x3d8] sm:$0xff]  ;;  %v305_v61 = vld [vmem:[#allocation3 + $0x688] sm:$0xff]  ;;  %v2103_v62 = vpack.c.bf16 %v202_v54, %v194_v53  ;;  %v210_v1 = vld [vmem:[#allocation3 + $0x390] sm:$0xff] }
  0x6a   :  { %2100 = vmatpush1.bf16.msra.mxu1 %v2099_v48  ;;  %v313_v63 = vld [vmem:[#allocation3 + $0x6c8] sm:$0xff]  ;;  %v218_v2 = vld [vmem:[#allocation3 + $0x3d0] sm:$0xff]  ;;  %v227_v3 = vld [vmem:[#allocation3 + $0x418] sm:$0xff] }
  0x6b   :  { %2040 = vmatpush1.bf16.msra.mxu0 %v2039_v55  ;;  %v211_v55 = vld [vmem:[#allocation3 + $0x398] sm:$0xff]  ;;  %2102 = vmatprep.subr.bf16.mxu1 %v2101_v52  ;;  %v2065_v6 = vpack.c.bf16 %v313_v63, %v305_v61  ;;  %v321_v9 = vld [vmem:[#allocation3 + $0x708] sm:$0xff]  ;;  %v2107_v10 = vpack.c.bf16 %v218_v2, %v210_v1  ;;  %v226_v13 = vld [vmem:[#allocation3 + $0x410] sm:$0xff] }
  0x6c   :  { %2042 = vmatprep.subr.bf16.mxu0 %v2041_v60  ;;  %v296_v60 = vld [vmem:[#allocation3 + $0x640] sm:$0xff]  ;;  %v2105_v0 = vpack.c.bf16 %v219_v56, %v211_v55  ;;  %v235_v4 = vld [vmem:[#allocation3 + $0x458] sm:$0xff]  ;;  %v329_v11 = vld [vmem:[#allocation3 + $0x748] sm:$0xff] }
  0x6d   :  { %v2063_v5 = vpack.c.bf16 %v296_v60, %v288_v59  ;;  %v2109_v12 = vpack.c.bf16 %v235_v4, %v227_v3  ;;  %v234_v14 = vld [vmem:[#allocation3 + $0x450] sm:$0xff]  ;;  %v243_v15 = vld [vmem:[#allocation3 + $0x498] sm:$0xff]  ;;  %v2069_v18 = vpack.c.bf16 %v329_v11, %v321_v9  ;;  %v337_v21 = vld [vmem:[#allocation3 + $0x788] sm:$0xff] }
  0x6e   :  { %2104 = vmatpush1.bf16.msra.mxu1 %v2103_v62  ;;  %v251_v16 = vld [vmem:[#allocation3 + $0x4d8] sm:$0xff]  ;;  %v2111_v22 = vpack.c.bf16 %v234_v14, %v226_v13  ;;  %v345_v23 = vld [vmem:[#allocation3 + $0x7c8] sm:$0xff]  ;;  %v242_v25 = vld [vmem:[#allocation3 + $0x490] sm:$0xff] }
  0x6f   :  { %2044 = vmatpush1.bf16.msra.mxu0 %v2043_v7  ;;  %v304_v7 = vld [vmem:[#allocation3 + $0x680] sm:$0xff]  ;;  %2106 = vmatprep.subr.bf16.mxu1 %v2105_v0  ;;  %v2113_v24 = vpack.c.bf16 %v251_v16, %v243_v15  ;;  %v250_v26 = vld [vmem:[#allocation3 + $0x4d0] sm:$0xff]  ;;  %v259_v27 = vld [vmem:[#allocation3 + $0x518] sm:$0xff]  ;;  %v2073_v30 = vpack.c.bf16 %v345_v23, %v337_v21 }
  0x70   :  { %2046 = vmatprep.subr.bf16.mxu0 %v2045_v8  ;;  %v312_v8 = vld [vmem:[#allocation3 + $0x6c0] sm:$0xff]  ;;  %v267_v28 = vld [vmem:[#allocation3 + $0x558] sm:$0xff]  ;;  %v2115_v33 = vpack.c.bf16 %v250_v26, %v242_v25  ;;  %v258_v34 = vld [vmem:[#allocation3 + $0x510] sm:$0xff] }
  0x71   :  { %v2067_v17 = vpack.c.bf16 %v312_v8, %v304_v7  ;;  %v2117_v35 = vpack.c.bf16 %v267_v28, %v259_v27  ;;  %v266_v36 = vld [vmem:[#allocation3 + $0x550] sm:$0xff]  ;;  %v101_v37 = vld [vmem:[#allocation3 + $0x28] sm:$0xff]  ;;  %v275_v39 = vld [vmem:[#allocation3 + $0x598] sm:$0xff] }
  0x72   :  { %2108 = vmatpush1.bf16.msra.mxu1 %v2107_v10  ;;  %v109_v38 = vld [vmem:[#allocation3 + $0x68] sm:$0xff]  ;;  %v283_v40 = vld [vmem:[#allocation3 + $0x5d8] sm:$0xff]  ;;  %v2119_v42 = vpack.c.bf16 %v266_v36, %v258_v34  ;;  %v100_v45 = vld [vmem:[#allocation3 + $0x20] sm:$0xff] }
  0x73   :  { %2048 = vmatpush1.bf16.msra.mxu0 %v2047_v19  ;;  %v320_v19 = vld [vmem:[#allocation3 + $0x700] sm:$0xff]  ;;  %2110 = vmatprep.subr.bf16.mxu1 %v2109_v12  ;;  %v2121_v47 = vpack.c.bf16 %v283_v40, %v275_v39  ;;  %v282_v48 = vld [vmem:[#allocation3 + $0x5d0] sm:$0xff]  ;;  %v117_v50 = vld [vmem:[#allocation3 + $0xa8] sm:$0xff] }
  0x74   :  { %2050 = vmatprep.subr.bf16.mxu0 %v2049_v20  ;;  %v328_v20 = vld [vmem:[#allocation3 + $0x740] sm:$0xff]  ;;  %v125_v52 = vld [vmem:[#allocation3 + $0xe8] sm:$0xff]  ;;  %v291_v53 = vld [vmem:[#allocation3 + $0x618] sm:$0xff] }
  0x75   :  { %v2071_v29 = vpack.c.bf16 %v328_v20, %v320_v19  ;;  %v108_v46 = vld [vmem:[#allocation3 + $0x60] sm:$0xff]  ;;  %v299_v54 = vld [vmem:[#allocation3 + $0x658] sm:$0xff]  ;;  %v298_v62 = vld [vmem:[#allocation3 + $0x650] sm:$0xff] }
  0x76   :  { %2112 = vmatpush1.bf16.msra.mxu1 %v2111_v22  ;;  %v2143_v55 = vpack.c.bf16 %v108_v46, %v100_v45  ;;  %v116_v59 = vld [vmem:[#allocation3 + $0xa0] sm:$0xff]  ;;  %v2125_v61 = vpack.c.bf16 %v299_v54, %v291_v53  ;;  %v133_v63 = vld [vmem:[#allocation3 + $0x128] sm:$0xff]  ;;  %v307_v1 = vld [vmem:[#allocation3 + $0x698] sm:$0xff] }
  0x77   :  { %2052 = vmatpush1.bf16.msra.mxu0 %v2051_v31  ;;  %v336_v31 = vld [vmem:[#allocation3 + $0x780] sm:$0xff]  ;;  %2114 = vmatprep.subr.bf16.mxu1 %v2113_v24  ;;  %v141_v0 = vld [vmem:[#allocation3 + $0x168] sm:$0xff]  ;;  %v315_v2 = vld [vmem:[#allocation3 + $0x6d8] sm:$0xff] }
  0x78   :  { %2054 = vmatprep.subr.bf16.mxu0 %v2053_v32  ;;  %v344_v32 = vld [vmem:[#allocation3 + $0x7c0] sm:$0xff]  ;;  %v2129_v9 = vpack.c.bf16 %v315_v2, %v307_v1  ;;  %v314_v10 = vld [vmem:[#allocation3 + $0x6d0] sm:$0xff]  ;;  %v149_v11 = vld [vmem:[#allocation3 + $0x1a8] sm:$0xff] }
  0x79   :  { %v2075_v41 = vpack.c.bf16 %v344_v32, %v336_v31  ;;  %v124_v60 = vld [vmem:[#allocation3 + $0xe0] sm:$0xff]  ;;  %v157_v12 = vld [vmem:[#allocation3 + $0x1e8] sm:$0xff]  ;;  %v323_v13 = vld [vmem:[#allocation3 + $0x718] sm:$0xff] }
  0x7a   :  { %2116 = vmatpush1.bf16.msra.mxu1 %v2115_v33  ;;  %v2147_v3 = vpack.c.bf16 %v124_v60, %v116_v59  ;;  %v132_v7 = vld [vmem:[#allocation3 + $0x120] sm:$0xff]  ;;  %v331_v14 = vld [vmem:[#allocation3 + $0x758] sm:$0xff]  ;;  %v330_v22 = vld [vmem:[#allocation3 + $0x750] sm:$0xff] }
  0x7b   :  { %2056 = vmatpush1.bf16.msra.mxu0 %v2055_v43  ;;  %v274_v43 = vld [vmem:[#allocation3 + $0x590] sm:$0xff]  ;;  %2118 = vmatprep.subr.bf16.mxu1 %v2117_v35  ;;  %v140_v8 = vld [vmem:[#allocation3 + $0x160] sm:$0xff]  ;;  %v2133_v21 = vpack.c.bf16 %v331_v14, %v323_v13  ;;  %v165_v23 = vld [vmem:[#allocation3 + $0x228] sm:$0xff] }
  0x7c   :  { %2058 = vmatprep.subr.bf16.mxu0 %v2057_v44  ;;  %v2141_v44 = vpack.c.bf16 %v109_v38, %v101_v37  ;;  %v2123_v56 = vpack.c.bf16 %v282_v48, %v274_v43  ;;  %v2151_v15 = vpack.c.bf16 %v140_v8, %v132_v7  ;;  %v148_v19 = vld [vmem:[#allocation3 + $0x1a0] sm:$0xff]  ;;  %v173_v24 = vld [vmem:[#allocation3 + $0x268] sm:$0xff]  ;;  %v339_v25 = vld [vmem:[#allocation3 + $0x798] sm:$0xff] }
  0x7d   :  { %v156_v20 = vld [vmem:[#allocation3 + $0x1e0] sm:$0xff]  ;;  %v347_v26 = vld [vmem:[#allocation3 + $0x7d8] sm:$0xff]  ;;  %v346_v34 = vld [vmem:[#allocation3 + $0x7d0] sm:$0xff] }
  0x7e   :  { %2120 = vmatpush1.bf16.msra.mxu1 %v2119_v42  ;;  %v2155_v27 = vpack.c.bf16 %v156_v20, %v148_v19  ;;  %v164_v31 = vld [vmem:[#allocation3 + $0x220] sm:$0xff]  ;;  %v2137_v33 = vpack.c.bf16 %v347_v26, %v339_v25  ;;  %v181_v35 = vld [vmem:[#allocation3 + $0x2a8] sm:$0xff]  ;;  %v103_v37 = vld [vmem:[#allocation3 + $0x38] sm:$0xff] }
  0x7f   :  { %2060 = vmatpush1.bf16.msra.mxu0 %v2059_v57  ;;  %v290_v57 = vld [vmem:[#allocation3 + $0x610] sm:$0xff]  ;;  %2122 = vmatprep.subr.bf16.mxu1 %v2121_v47  ;;  %v172_v32 = vld [vmem:[#allocation3 + $0x260] sm:$0xff]  ;;  %v189_v36 = vld [vmem:[#allocation3 + $0x2e8] sm:$0xff] }
  0x80   :  { %2062 = vmatprep.subr.bf16.mxu0 %v2061_v58  ;;  %v2145_v58 = vpack.c.bf16 %v125_v52, %v117_v50  ;;  %v2127_v4 = vpack.c.bf16 %v298_v62, %v290_v57  ;;  %v111_v38 = vld [vmem:[#allocation3 + $0x78] sm:$0xff]  ;;  %v2159_v39 = vpack.c.bf16 %v172_v32, %v164_v31  ;;  %v180_v42 = vld [vmem:[#allocation3 + $0x2a0] sm:$0xff]  ;;  %v205_v45 = vld [vmem:[#allocation3 + $0x368] sm:$0xff] }
  0x81   :  { %v188_v43 = vld [vmem:[#allocation3 + $0x2e0] sm:$0xff]  ;;  %v2205_v46 = vpack.c.bf16 %v111_v38, %v103_v37  ;;  %v102_v47 = vld [vmem:[#allocation3 + $0x30] sm:$0xff]  ;;  %v119_v50 = vld [vmem:[#allocation3 + $0xb8] sm:$0xff] }
  0x82   :  { %2124 = vmatpush1.bf16.msra.mxu1 %v2123_v56  ;;  %v110_v48 = vld [vmem:[#allocation3 + $0x70] sm:$0xff]  ;;  %v127_v52 = vld [vmem:[#allocation3 + $0xf8] sm:$0xff]  ;;  %v2163_v53 = vpack.c.bf16 %v188_v43, %v180_v42  ;;  %v204_v56 = vld [vmem:[#allocation3 + $0x360] sm:$0xff] }
  0x83   :  { %2064 = vmatpush1.bf16.msra.mxu0 %v2063_v5  ;;  %v306_v5 = vld [vmem:[#allocation3 + $0x690] sm:$0xff]  ;;  %2126 = vmatprep.subr.bf16.mxu1 %v2125_v61  ;;  %v213_v57 = vld [vmem:[#allocation3 + $0x3a8] sm:$0xff]  ;;  %v2209_v60 = vpack.c.bf16 %v127_v52, %v119_v50  ;;  %v244_v26 = vld [vmem:[#allocation3 + $0x4a0] sm:$0xff] }
  0x84   :  { %2066 = vmatprep.subr.bf16.mxu0 %v2065_v6  ;;  %v2149_v6 = vpack.c.bf16 %v141_v0, %v133_v63  ;;  %v2131_v16 = vpack.c.bf16 %v314_v10, %v306_v5  ;;  %v221_v59 = vld [vmem:[#allocation3 + $0x3e8] sm:$0xff]  ;;  %v118_v61 = vld [vmem:[#allocation3 + $0xb0] sm:$0xff]  ;;  %v135_v63 = vld [vmem:[#allocation3 + $0x138] sm:$0xff] }
  0x85   :  { %v126_v62 = vld [vmem:[#allocation3 + $0xf0] sm:$0xff]  ;;  %v143_v0 = vld [vmem:[#allocation3 + $0x178] sm:$0xff]  ;;  %v2169_v2 = vpack.c.bf16 %v221_v59, %v213_v57  ;;  %v229_v5 = vld [vmem:[#allocation3 + $0x428] sm:$0xff] }
  0x86   :  { %2128 = vmatpush1.bf16.msra.mxu1 %v2127_v4  ;;  %v220_v4 = vld [vmem:[#allocation3 + $0x3e0] sm:$0xff]  ;;  %v237_v7 = vld [vmem:[#allocation3 + $0x468] sm:$0xff]  ;;  %v2213_v8 = vpack.c.bf16 %v143_v0, %v135_v63  ;;  %v142_v10 = vld [vmem:[#allocation3 + $0x170] sm:$0xff] }
  0x87   :  { %2068 = vmatpush1.bf16.msra.mxu0 %v2067_v17  ;;  %v322_v17 = vld [vmem:[#allocation3 + $0x710] sm:$0xff]  ;;  %2130 = vmatprep.subr.bf16.mxu1 %v2129_v9  ;;  %v2173_v14 = vpack.c.bf16 %v237_v7, %v229_v5  ;;  %v253_v19 = vld [vmem:[#allocation3 + $0x4e8] sm:$0xff]  ;;  %v260_v38 = vld [vmem:[#allocation3 + $0x520] sm:$0xff] }
  0x88   :  { %2070 = vmatprep.subr.bf16.mxu0 %v2069_v18  ;;  %v2153_v18 = vpack.c.bf16 %v157_v12, %v149_v11  ;;  %v2135_v28 = vpack.c.bf16 %v330_v22, %v322_v17  ;;  %v134_v9 = vld [vmem:[#allocation3 + $0x130] sm:$0xff]  ;;  %v151_v11 = vld [vmem:[#allocation3 + $0x1b8] sm:$0xff]  ;;  %v245_v17 = vld [vmem:[#allocation3 + $0x4a8] sm:$0xff] }
  0x89   :  { %v159_v12 = vld [vmem:[#allocation3 + $0x1f8] sm:$0xff]  ;;  %v158_v22 = vld [vmem:[#allocation3 + $0x1f0] sm:$0xff]  ;;  %v2177_v25 = vpack.c.bf16 %v253_v19, %v245_v17  ;;  %v285_v42 = vld [vmem:[#allocation3 + $0x5e8] sm:$0xff] }
  0x8a   :  { %2132 = vmatpush1.bf16.msra.mxu1 %v2131_v16  ;;  %v236_v16 = vld [vmem:[#allocation3 + $0x460] sm:$0xff]  ;;  %v2217_v20 = vpack.c.bf16 %v159_v12, %v151_v11  ;;  %v166_v32 = vld [vmem:[#allocation3 + $0x230] sm:$0xff] }
  0x8b   :  { %2072 = vmatpush1.bf16.msra.mxu0 %v2071_v29  ;;  %v338_v29 = vld [vmem:[#allocation3 + $0x790] sm:$0xff]  ;;  %2134 = vmatprep.subr.bf16.mxu1 %v2133_v21  ;;  %v276_v52 = vld [vmem:[#allocation3 + $0x5a0] sm:$0xff] }
  0x8c   :  { %2074 = vmatprep.subr.bf16.mxu0 %v2073_v30  ;;  %v2157_v30 = vpack.c.bf16 %v173_v24, %v165_v23  ;;  %v2139_v40 = vpack.c.bf16 %v346_v34, %v338_v29  ;;  %v150_v21 = vld [vmem:[#allocation3 + $0x1b0] sm:$0xff]  ;;  %v167_v23 = vld [vmem:[#allocation3 + $0x238] sm:$0xff]  ;;  %v292_v0 = vld [vmem:[#allocation3 + $0x620] sm:$0xff] }
  0x8d   :  { %v175_v24 = vld [vmem:[#allocation3 + $0x278] sm:$0xff]  ;;  %v2219_v29 = vpack.c.bf16 %v158_v22, %v150_v21  ;;  %v206_v59 = vld [vmem:[#allocation3 + $0x370] sm:$0xff]  ;;  %v308_v12 = vld [vmem:[#allocation3 + $0x6a0] sm:$0xff] }
  0x8e   :  { %2136 = vmatpush1.bf16.msra.mxu1 %v2135_v28  ;;  %v261_v28 = vld [vmem:[#allocation3 + $0x528] sm:$0xff]  ;;  %v2221_v31 = vpack.c.bf16 %v175_v24, %v167_v23  ;;  %v183_v34 = vld [vmem:[#allocation3 + $0x2b8] sm:$0xff]  ;;  %v222_v7 = vld [vmem:[#allocation3 + $0x3f0] sm:$0xff] }
  0x8f   :  { %2076 = vmatpush1.bf16.msra.mxu0 %v2075_v41  ;;  %v2161_v41 = vpack.c.bf16 %v189_v36, %v181_v35  ;;  %2138 = vmatprep.subr.bf16.mxu1 %v2137_v33  ;;  %v174_v33 = vld [vmem:[#allocation3 + $0x270] sm:$0xff]  ;;  %v191_v35 = vld [vmem:[#allocation3 + $0x2f8] sm:$0xff]  ;;  %v324_v24 = vld [vmem:[#allocation3 + $0x720] sm:$0xff] }
  0x90   :  { %2142 = vmatprep.subr.bf16.mxu0 %v2141_v44  ;;  %v197_v44 = vld [vmem:[#allocation3 + $0x328] sm:$0xff]  ;;  %v2225_v43 = vpack.c.bf16 %v191_v35, %v183_v34  ;;  %v238_v19 = vld [vmem:[#allocation3 + $0x470] sm:$0xff]  ;;  %v255_v21 = vld [vmem:[#allocation3 + $0x4f8] sm:$0xff] }
  0x91   :  { %v2165_v54 = vpack.c.bf16 %v205_v45, %v197_v44  ;;  %v182_v44 = vld [vmem:[#allocation3 + $0x2b0] sm:$0xff]  ;;  %v340_v35 = vld [vmem:[#allocation3 + $0x7a0] sm:$0xff] }
  0x92   :  { %470 = vmatmul.mubr.f32.vlgmr.msra.gmra.mrb[0].mxu0 %v2989_v49  ;;  %2140 = vmatpush1.bf16.msra.mxu1 %v2139_v40  ;;  %v277_v40 = vld [vmem:[#allocation3 + $0x5a8] sm:$0xff]  ;;  %v190_v45 = vld [vmem:[#allocation3 + $0x2f0] sm:$0xff] }
  0x93   :  { %2144 = vmatpush1.bf16.msra.mxu0 %v2143_v55  ;;  %611 = vmatprep.mubr.f32.mxu0 %v2993_v51  ;;  %v196_v55 = vld [vmem:[#allocation3 + $0x320] sm:$0xff]  ;;  %v2185_v50 = vpack.c.bf16 %v285_v42, %v277_v40  ;;  %v270_v42 = vld [vmem:[#allocation3 + $0x570] sm:$0xff] }
  0x94   :  { %2146 = vmatprep.subr.bf16.mxu0 %v2145_v58  ;;  %v2207_v58 = vpack.c.bf16 %v110_v48, %v102_v47  ;;  %2206 = vmatprep.subr.bf16.mxu1 %v2205_v46  ;;  %v2167_v1 = vpack.c.bf16 %v204_v56, %v196_v55  ;;  %v199_v46 = vld [vmem:[#allocation3 + $0x338] sm:$0xff]  ;;  %v2227_v55 = vpack.c.bf16 %v190_v45, %v182_v44  ;;  %v301_v56 = vld [vmem:[#allocation3 + $0x668] sm:$0xff] }
  0x95   :  { %541 = vmatmul.mubr.f32.vlgmr.msra.gmra.mrb[0].mxu1 %v2989_v49  ;;  %v207_v47 = vld [vmem:[#allocation3 + $0x378] sm:$0xff] }
  0x96   :  { %2208 = vmatpush1.bf16.msra.mxu1 %v2207_v58  ;;  %682 = vmatprep.mubr.f32.mxu1 %v2993_v51  ;;  %v2229_v57 = vpack.c.bf16 %v207_v47, %v199_v46  ;;  %v198_v58 = vld [vmem:[#allocation3 + $0x330] sm:$0xff]  ;;  %v287_v44 = vld [vmem:[#allocation3 + $0x5f8] sm:$0xff]  ;;  %v713_v47 = vld [vmem:[#allocation5] sm:$0xff] }
  0x97   :  { %2148 = vmatpush1.bf16.msra.mxu0 %v2147_v3  ;;  %v212_v3 = vld [vmem:[#allocation3 + $0x3a0] sm:$0xff]  ;;  %2210 = vmatprep.subr.bf16.mxu1 %v2209_v60  ;;  %v215_v60 = vld [vmem:[#allocation3 + $0x3b8] sm:$0xff] }
  0x98   :  { %2150 = vmatprep.subr.bf16.mxu0 %v2149_v6  ;;  %v2211_v6 = vpack.c.bf16 %v126_v62, %v118_v61  ;;  %v2171_v13 = vpack.c.bf16 %v220_v4, %v212_v3  ;;  %v223_v61 = vld [vmem:[#allocation3 + $0x3f8] sm:$0xff]  ;;  %v2231_v3 = vpack.c.bf16 %v206_v59, %v198_v58  ;;  %v317_v4 = vld [vmem:[#allocation3 + $0x6e8] sm:$0xff] }
  0x99   :  { %v2233_v5 = vpack.c.bf16 %v223_v61, %v215_v60  ;;  %v303_v58 = vld [vmem:[#allocation3 + $0x678] sm:$0xff]  ;;  %v717_v61 = vld [vmem:[#allocation5 + $0x20] sm:$0xff] }
  0x9a   :  { %2212 = vmatpush1.bf16.msra.mxu1 %v2211_v6  ;;  %v214_v6 = vld [vmem:[#allocation3 + $0x3b0] sm:$0xff] }
  0x9b   :  { %2152 = vmatpush1.bf16.msra.mxu0 %v2151_v15  ;;  %v228_v15 = vld [vmem:[#allocation3 + $0x420] sm:$0xff]  ;;  %2214 = vmatprep.subr.bf16.mxu1 %v2213_v8  ;;  %v231_v8 = vld [vmem:[#allocation3 + $0x438] sm:$0xff] }
  0x9c   :  { %2154 = vmatprep.subr.bf16.mxu0 %v2153_v18  ;;  %v2215_v18 = vpack.c.bf16 %v142_v10, %v134_v9  ;;  %v2175_v51 = vpack.c.bf16 %v236_v16, %v228_v15  ;;  %v239_v9 = vld [vmem:[#allocation3 + $0x478] sm:$0xff]  ;;  %v2235_v15 = vpack.c.bf16 %v222_v7, %v214_v6  ;;  %v333_v16 = vld [vmem:[#allocation3 + $0x768] sm:$0xff] }
  0x9d   :  { %v2237_v17 = vpack.c.bf16 %v239_v9, %v231_v8  ;;  %v319_v6 = vld [vmem:[#allocation3 + $0x6f8] sm:$0xff]  ;;  %v721_v9 = vld [vmem:[#allocation5 + $0x40] sm:$0xff] }
  0x9e   :  { %2216 = vmatpush1.bf16.msra.mxu1 %v2215_v18  ;;  %v230_v18 = vld [vmem:[#allocation3 + $0x430] sm:$0xff] }
  0x9f   :  { %2156 = vmatpush1.bf16.msra.mxu0 %v2155_v27  ;;  %v252_v27 = vld [vmem:[#allocation3 + $0x4e0] sm:$0xff]  ;;  %2218 = vmatprep.subr.bf16.mxu1 %v2217_v20  ;;  %v247_v20 = vld [vmem:[#allocation3 + $0x4b8] sm:$0xff] }
  0xa0   :  { %2158 = vmatprep.subr.bf16.mxu0 %v2157_v30  ;;  %v269_v30 = vld [vmem:[#allocation3 + $0x568] sm:$0xff]  ;;  %v2179_v36 = vpack.c.bf16 %v252_v27, %v244_v26  ;;  %v2239_v26 = vpack.c.bf16 %v238_v19, %v230_v18  ;;  %v335_v18 = vld [vmem:[#allocation3 + $0x778] sm:$0xff] }
  0xa1   :  { %v2181_v37 = vpack.c.bf16 %v269_v30, %v261_v28  ;;  %v349_v27 = vld [vmem:[#allocation3 + $0x7e8] sm:$0xff]  ;;  %v2241_v28 = vpack.c.bf16 %v255_v21, %v247_v20  ;;  %v254_v30 = vld [vmem:[#allocation3 + $0x4f0] sm:$0xff]  ;;  %v725_v20 = vld [vmem:[#allocation5 + $0x60] sm:$0xff] }
  0xa2   :  { %2220 = vmatpush1.bf16.msra.mxu1 %v2219_v29  ;;  %v246_v29 = vld [vmem:[#allocation3 + $0x4b0] sm:$0xff] }
  0xa3   :  { %2160 = vmatpush1.bf16.msra.mxu0 %v2159_v39  ;;  %v268_v39 = vld [vmem:[#allocation3 + $0x560] sm:$0xff]  ;;  %2222 = vmatprep.subr.bf16.mxu1 %v2221_v31  ;;  %v263_v31 = vld [vmem:[#allocation3 + $0x538] sm:$0xff]  ;;  %v727_v21 = vld [vmem:[#allocation5 + $0x70] sm:$0xff] }
  0xa4   :  { %2162 = vmatprep.subr.bf16.mxu0 %v2161_v41  ;;  %v2223_v41 = vpack.c.bf16 %v174_v33, %v166_v32  ;;  %v2183_v48 = vpack.c.bf16 %v268_v39, %v260_v38  ;;  %v271_v32 = vld [vmem:[#allocation3 + $0x578] sm:$0xff]  ;;  %v2243_v38 = vpack.c.bf16 %v254_v30, %v246_v29  ;;  %v2283_v29 = vpack.c.bf16 %v727_v21, %v725_v20 }
  0xa5   :  { %v716_v39 = vld [vmem:[#allocation5 + $0x18] sm:$0xff]  ;;  %v2245_v40 = vpack.c.bf16 %v271_v32, %v263_v31  ;;  %v729_v31 = vld [vmem:[#allocation5 + $0x80] sm:$0xff]  ;;  %v731_v32 = vld [vmem:[#allocation5 + $0x90] sm:$0xff] }
  0xa6   :  { %2224 = vmatpush1.bf16.msra.mxu1 %v2223_v41  ;;  %v262_v41 = vld [vmem:[#allocation3 + $0x530] sm:$0xff] }
  0xa7   :  { %2164 = vmatpush1.bf16.msra.mxu0 %v2163_v53  ;;  %v284_v53 = vld [vmem:[#allocation3 + $0x5e0] sm:$0xff]  ;;  %2226 = vmatprep.subr.bf16.mxu1 %v2225_v43  ;;  %v279_v43 = vld [vmem:[#allocation3 + $0x5b8] sm:$0xff] }
  0xa8   :  { %2166 = vmatprep.subr.bf16.mxu0 %v2165_v54  ;;  %v293_v54 = vld [vmem:[#allocation3 + $0x628] sm:$0xff]  ;;  %v2187_v62 = vpack.c.bf16 %v284_v53, %v276_v52  ;;  %v2247_v52 = vpack.c.bf16 %v270_v42, %v262_v41  ;;  %v720_v53 = vld [vmem:[#allocation5 + $0x38] sm:$0xff]  ;;  %v733_v41 = vld [vmem:[#allocation5 + $0xa0] sm:$0xff] }
  0xa9   :  { %v2189_v63 = vpack.c.bf16 %v301_v56, %v293_v54  ;;  %v2249_v54 = vpack.c.bf16 %v287_v44, %v279_v43  ;;  %v286_v56 = vld [vmem:[#allocation3 + $0x5f0] sm:$0xff]  ;;  %v738_v44 = vld [vmem:[#allocation5 + $0xc8] sm:$0xff] }
  0xaa   :  { %2228 = vmatpush1.bf16.msra.mxu1 %v2227_v55  ;;  %v278_v55 = vld [vmem:[#allocation3 + $0x5b0] sm:$0xff] }
  0xab   :  { %2168 = vmatpush1.bf16.msra.mxu0 %v2167_v1  ;;  %v300_v1 = vld [vmem:[#allocation3 + $0x660] sm:$0xff]  ;;  %2230 = vmatprep.subr.bf16.mxu1 %v2229_v57  ;;  %v295_v57 = vld [vmem:[#allocation3 + $0x638] sm:$0xff]  ;;  %v735_v42 = vld [vmem:[#allocation5 + $0xb0] sm:$0xff] }
  0xac   :  { %2170 = vmatprep.subr.bf16.mxu0 %v2169_v2  ;;  %v309_v2 = vld [vmem:[#allocation3 + $0x6a8] sm:$0xff]  ;;  %v2191_v10 = vpack.c.bf16 %v300_v1, %v292_v0  ;;  %v2251_v0 = vpack.c.bf16 %v286_v56, %v278_v55  ;;  %v724_v1 = vld [vmem:[#allocation5 + $0x58] sm:$0xff] }
  0xad   :  { %v2193_v11 = vpack.c.bf16 %v317_v4, %v309_v2  ;;  %v2253_v2 = vpack.c.bf16 %v303_v58, %v295_v57  ;;  %v302_v4 = vld [vmem:[#allocation3 + $0x670] sm:$0xff]  ;;  %v2764_v55 = vld.sshfl [vmem:[%s3130_s0] sm:$0x33 pattern:$0x76325410] }
  0xae   :  { %2232 = vmatpush1.bf16.msra.mxu1 %v2231_v3  ;;  %v294_v3 = vld [vmem:[#allocation3 + $0x630] sm:$0xff]  ;;  %v741_v57 = vld [vmem:[#allocation5 + $0xe0] sm:$0xff] }
  0xaf   :  { %2172 = vmatpush1.bf16.msra.mxu0 %v2171_v13  ;;  %v316_v13 = vld [vmem:[#allocation3 + $0x6e0] sm:$0xff]  ;;  %2234 = vmatprep.subr.bf16.mxu1 %v2233_v5  ;;  %v311_v5 = vld [vmem:[#allocation3 + $0x6b8] sm:$0xff]  ;;  %v743_v58 = vld [vmem:[#allocation5 + $0xf0] sm:$0xff] }
  0xb0   :  { %2174 = vmatprep.subr.bf16.mxu0 %v2173_v14  ;;  %v325_v14 = vld [vmem:[#allocation3 + $0x728] sm:$0xff]  ;;  %v2195_v22 = vpack.c.bf16 %v316_v13, %v308_v12  ;;  %v2255_v12 = vpack.c.bf16 %v302_v4, %v294_v3  ;;  %v728_v13 = vld [vmem:[#allocation5 + $0x78] sm:$0xff] }
  0xb1   :  { %v2197_v23 = vpack.c.bf16 %v333_v16, %v325_v14  ;;  %v2257_v14 = vpack.c.bf16 %v319_v6, %v311_v5  ;;  %v318_v16 = vld [vmem:[#allocation3 + $0x6f0] sm:$0xff]  ;;  %v749_v5 = vld [vmem:[#allocation5 + $0x120] sm:$0xff] }
  0xb2   :  { %2236 = vmatpush1.bf16.msra.mxu1 %v2235_v15  ;;  %v310_v15 = vld [vmem:[#allocation3 + $0x6b0] sm:$0xff] }
  0xb3   :  { %2176 = vmatpush1.bf16.msra.mxu0 %v2175_v51  ;;  %v332_v51 = vld [vmem:[#allocation3 + $0x760] sm:$0xff]  ;;  %2238 = vmatprep.subr.bf16.mxu1 %v2237_v17  ;;  %v327_v17 = vld [vmem:[#allocation3 + $0x738] sm:$0xff]  ;;  %v751_v6 = vld [vmem:[#allocation5 + $0x130] sm:$0xff] }
  0xb4   :  { %2178 = vmatprep.subr.bf16.mxu0 %v2177_v25  ;;  %v341_v25 = vld [vmem:[#allocation3 + $0x7a8] sm:$0xff]  ;;  %v2199_v33 = vpack.c.bf16 %v332_v51, %v324_v24  ;;  %v732_v24 = vld [vmem:[#allocation5 + $0x98] sm:$0xff]  ;;  %v2261_v51 = vpack.c.bf16 %v335_v18, %v327_v17  ;;  %v757_v17 = vld [vmem:[#allocation5 + $0x160] sm:$0xff] }
  0xb5   :  { %v2201_v34 = vpack.c.bf16 %v349_v27, %v341_v25  ;;  %v326_v25 = vld [vmem:[#allocation3 + $0x730] sm:$0xff]  ;;  %v343_v27 = vld [vmem:[#allocation3 + $0x7b8] sm:$0xff] }
  0xb6   :  { %2240 = vmatpush1.bf16.msra.mxu1 %v2239_v26  ;;  %v334_v26 = vld [vmem:[#allocation3 + $0x770] sm:$0xff] }
  0xb7   :  { %2180 = vmatpush1.bf16.msra.mxu0 %v2179_v36  ;;  %v348_v36 = vld [vmem:[#allocation3 + $0x7e0] sm:$0xff]  ;;  %2242 = vmatprep.subr.bf16.mxu1 %v2241_v28  ;;  %v351_v28 = vld [vmem:[#allocation3 + $0x7f8] sm:$0xff]  ;;  %v759_v18 = vld [vmem:[#allocation5 + $0x170] sm:$0xff] }
  0xb8   :  { %2182 = vmatprep.subr.bf16.mxu0 %v2181_v37  ;;  %v714_v37 = vld [vmem:[#allocation5 + $0x8] sm:$0xff]  ;;  %v2203_v45 = vpack.c.bf16 %v348_v36, %v340_v35  ;;  %v736_v35 = vld [vmem:[#allocation5 + $0xb8] sm:$0xff]  ;;  %v2265_v36 = vpack.c.bf16 %v351_v28, %v343_v27  ;;  %v2315_v20 = vpack.c.bf16 %v759_v18, %v757_v17  ;;  %v765_v27 = vld [vmem:[#allocation5 + $0x1a0] sm:$0xff] }
  0xb9   :  { %v2269_v46 = vpack.c.bf16 %v716_v39, %v714_v37  ;;  %v342_v37 = vld [vmem:[#allocation3 + $0x7b0] sm:$0xff]  ;;  %v2287_v39 = vpack.c.bf16 %v731_v32, %v729_v31  ;;  %v794_v18 = vld [vmem:[#allocation5 + $0x288] sm:$0xff] }
  0xba   :  { %2244 = vmatpush1.bf16.msra.mxu1 %v2243_v38  ;;  %v350_v38 = vld [vmem:[#allocation3 + $0x7f0] sm:$0xff] }
  0xbb   :  { %2184 = vmatpush1.bf16.msra.mxu0 %v2183_v48  ;;  %v715_v48 = vld [vmem:[#allocation5 + $0x10] sm:$0xff]  ;;  %2246 = vmatprep.subr.bf16.mxu1 %v2245_v40  ;;  %v2267_v43 = vpack.c.bf16 %v350_v38, %v342_v37 }
  0xbc   :  { %2186 = vmatprep.subr.bf16.mxu0 %v2185_v50  ;;  %v718_v50 = vld [vmem:[#allocation5 + $0x28] sm:$0xff]  ;;  %v2271_v59 = vpack.c.bf16 %v715_v48, %v713_v47  ;;  %v737_v48 = vld [vmem:[#allocation5 + $0xc0] sm:$0xff]  ;;  %v767_v28 = vld [vmem:[#allocation5 + $0x1b0] sm:$0xff] }
  0xbd   :  { %v2273_v60 = vpack.c.bf16 %v720_v53, %v718_v50  ;;  %v739_v50 = vld [vmem:[#allocation5 + $0xd0] sm:$0xff]  ;;  %v744_v53 = vld [vmem:[#allocation5 + $0xf8] sm:$0xff]  ;;  %v2323_v31 = vpack.c.bf16 %v767_v28, %v765_v27 }
  0xbe   :  { %2248 = vmatpush1.bf16.msra.mxu1 %v2247_v52  ;;  %v742_v52 = vld [vmem:[#allocation5 + $0xe8] sm:$0xff]  ;;  %v791_v17 = vld [vmem:[#allocation5 + $0x270] sm:$0xff] }
  0xbf   :  { %2188 = vmatpush1.bf16.msra.mxu0 %v2187_v62  ;;  %v719_v62 = vld [vmem:[#allocation5 + $0x30] sm:$0xff]  ;;  %2250 = vmatprep.subr.bf16.mxu1 %v2249_v54  ;;  %v2295_v54 = vpack.c.bf16 %v739_v50, %v737_v48  ;;  %v2297_v56 = vpack.c.bf16 %v744_v53, %v742_v52  ;;  %v3013_v48 = vld [vmem:[%s3132_s2] sm:$0xff] }
  0xc0   :  { %2190 = vmatprep.subr.bf16.mxu0 %v2189_v63  ;;  %v722_v63 = vld [vmem:[#allocation5 + $0x48] sm:$0xff]  ;;  %v2275_v7 = vpack.c.bf16 %v719_v62, %v717_v61  ;;  %v2299_v61 = vpack.c.bf16 %v743_v58, %v741_v57  ;;  %v777_v58 = vld [vmem:[#allocation5 + $0x200] sm:$0xff] }
  0xc1   :  { %v2277_v8 = vpack.c.bf16 %v724_v1, %v722_v63  ;;  %v745_v63 = vld [vmem:[#allocation5 + $0x100] sm:$0xff]  ;;  %v750_v1 = vld [vmem:[#allocation5 + $0x128] sm:$0xff] }
  0xc2   :  { %2252 = vmatpush1.bf16.msra.mxu1 %v2251_v0  ;;  %v747_v0 = vld [vmem:[#allocation5 + $0x110] sm:$0xff] }
  0xc3   :  { %2192 = vmatpush1.bf16.msra.mxu0 %v2191_v10  ;;  %v723_v10 = vld [vmem:[#allocation5 + $0x50] sm:$0xff]  ;;  %2254 = vmatprep.subr.bf16.mxu1 %v2253_v2  ;;  %v752_v2 = vld [vmem:[#allocation5 + $0x138] sm:$0xff]  ;;  %v2303_v3 = vpack.c.bf16 %v747_v0, %v745_v63 }
  0xc4   :  { %2194 = vmatprep.subr.bf16.mxu0 %v2193_v11  ;;  %v726_v11 = vld [vmem:[#allocation5 + $0x68] sm:$0xff]  ;;  %v2305_v4 = vpack.c.bf16 %v752_v2, %v750_v1 }
  0xc5   :  { %v2281_v19 = vpack.c.bf16 %v728_v13, %v726_v11  ;;  %v753_v11 = vld [vmem:[#allocation5 + $0x140] sm:$0xff]  ;;  %v758_v13 = vld [vmem:[#allocation5 + $0x168] sm:$0xff] }
  0xc6   :  { %2256 = vmatpush1.bf16.msra.mxu1 %v2255_v12  ;;  %v755_v12 = vld [vmem:[#allocation5 + $0x150] sm:$0xff] }
  0xc7   :  { %2196 = vmatpush1.bf16.msra.mxu0 %v2195_v22  ;;  %v730_v22 = vld [vmem:[#allocation5 + $0x88] sm:$0xff]  ;;  %2258 = vmatprep.subr.bf16.mxu1 %v2257_v14  ;;  %v760_v14 = vld [vmem:[#allocation5 + $0x178] sm:$0xff] }
  0xc8   :  { %2198 = vmatprep.subr.bf16.mxu0 %v2197_v23  ;;  %v2259_v23 = vpack.c.bf16 %v318_v16, %v310_v15  ;;  %v2285_v30 = vpack.c.bf16 %v732_v24, %v730_v22  ;;  %v2311_v15 = vpack.c.bf16 %v755_v12, %v753_v11  ;;  %v2313_v16 = vpack.c.bf16 %v760_v14, %v758_v13  ;;  %v761_v22 = vld [vmem:[#allocation5 + $0x180] sm:$0xff]  ;;  %v766_v24 = vld [vmem:[#allocation5 + $0x1a8] sm:$0xff]  ;;  %v787_v11 = vld [vmem:[#allocation5 + $0x250] sm:$0xff] }
  0xc9   :  { %v790_v12 = vld [vmem:[#allocation5 + $0x268] sm:$0xff]  ;;  %v792_v13 = vld [vmem:[#allocation5 + $0x278] sm:$0xff] }
  0xca   :  { %2260 = vmatpush1.bf16.msra.mxu1 %v2259_v23  ;;  %v763_v23 = vld [vmem:[#allocation5 + $0x190] sm:$0xff] }
  0xcb   :  { %2200 = vmatpush1.bf16.msra.mxu0 %v2199_v33  ;;  %v734_v33 = vld [vmem:[#allocation5 + $0xa8] sm:$0xff]  ;;  %2262 = vmatprep.subr.bf16.mxu1 %v2261_v51  ;;  %v768_v51 = vld [vmem:[#allocation5 + $0x1b8] sm:$0xff] }
  0xcc   :  { %2202 = vmatprep.subr.bf16.mxu0 %v2201_v34  ;;  %v2263_v34 = vpack.c.bf16 %v334_v26, %v326_v25  ;;  %v2289_v40 = vpack.c.bf16 %v736_v35, %v734_v33  ;;  %v2319_v25 = vpack.c.bf16 %v763_v23, %v761_v22  ;;  %v2321_v26 = vpack.c.bf16 %v768_v51, %v766_v24  ;;  %v769_v33 = vld [vmem:[#allocation5 + $0x1c0] sm:$0xff]  ;;  %v774_v35 = vld [vmem:[#allocation5 + $0x1e8] sm:$0xff]  ;;  %v795_v23 = vld [vmem:[#allocation5 + $0x290] sm:$0xff] }
  0xcd   :  { %v793_v22 = vld [vmem:[#allocation5 + $0x280] sm:$0xff]  ;;  %v798_v24 = vld [vmem:[#allocation5 + $0x2a8] sm:$0xff]  ;;  %v800_v51 = vld [vmem:[#allocation5 + $0x2b8] sm:$0xff] }
  0xce   :  { %2264 = vmatpush1.bf16.msra.mxu1 %v2263_v34  ;;  %v771_v34 = vld [vmem:[#allocation5 + $0x1d0] sm:$0xff]  ;;  %v2353_v28 = vpack.c.bf16 %v800_v51, %v798_v24 }
  0xcf   :  { %2204 = vmatpush1.bf16.msra.mxu0 %v2203_v45  ;;  %v740_v45 = vld [vmem:[#allocation5 + $0xd8] sm:$0xff]  ;;  %2266 = vmatprep.subr.bf16.mxu1 %v2265_v36  ;;  %v2327_v37 = vpack.c.bf16 %v771_v34, %v769_v33  ;;  %v831_v24 = vld [vmem:[#allocation5 + $0x3b0] sm:$0xff] }
  0xd0   :  { %2270 = vmatprep.subr.bf16.mxu0 %v2269_v46  ;;  %v2291_v46 = vpack.c.bf16 %v735_v42, %v733_v41  ;;  %v2293_v47 = vpack.c.bf16 %v740_v45, %v738_v44  ;;  %v776_v36 = vld [vmem:[#allocation5 + $0x1f8] sm:$0xff]  ;;  %v778_v41 = vld [vmem:[#allocation5 + $0x208] sm:$0xff]  ;;  %v354_v45 = vlaneseq }
  0xd1   :  { %v2329_v38 = vpack.c.bf16 %v776_v36, %v774_v35  ;;  %v780_v42 = vld [vmem:[#allocation5 + $0x218] sm:$0xff] }
  0xd2   :  { %612 = vmatmul.mubr.f32.vlgmr.msra.gmra.mrb[2].mxu0 %v2989_v49  ;;  %v2279_v49 = vpack.c.bf16 %v723_v10, %v721_v9  ;;  %2268 = vmatpush1.bf16.msra.mxu1 %v2267_v43  ;;  %v2307_v9 = vpack.c.bf16 %v751_v6, %v749_v5  ;;  %v2333_v44 = vpack.c.bf16 %v780_v42, %v778_v41  ;;  %v786_v6 = vld [vmem:[#allocation5 + $0x248] sm:$0xff]  ;;  %v804_v33 = vld [vmem:[#allocation5 + $0x2d8] sm:$0xff] }
  0xd3   :  { %2272 = vmatpush1.bf16.msra.mxu0 %v2271_v59  ;;  %v746_v59 = vld [vmem:[#allocation5 + $0x108] sm:$0xff]  ;;  %v808_v41 = vld [vmem:[#allocation5 + $0x2f8] sm:$0xff] }
  0xd4   :  { %2274 = vmatprep.subr.bf16.mxu0 %v2273_v60  ;;  %v748_v60 = vld [vmem:[#allocation5 + $0x118] sm:$0xff] }
  0xd5   :  { %683 = vmatmul.mubr.f32.vlgmr.msra.gmra.mrb[2].mxu1 %v2764_v55  ;;  %v2301_v62 = vpack.c.bf16 %v748_v60, %v746_v59  ;;  %v779_v59 = vld [vmem:[#allocation5 + $0x210] sm:$0xff] }
  0xd6   :  { %v2335_v0 = vpack.c.bf16 %v779_v59, %v777_v58  ;;  %v811_v58 = vld [vmem:[#allocation5 + $0x310] sm:$0xff]  ;;  %v814_v59 = vld [vmem:[#allocation5 + $0x328] sm:$0xff] }
  0xd7   :  { %2276 = vmatpush1.bf16.msra.mxu0 %v2275_v7  ;;  %v754_v7 = vld [vmem:[#allocation5 + $0x148] sm:$0xff] }
  0xd8   :  { %2278 = vmatprep.subr.bf16.mxu0 %v2277_v8  ;;  %v756_v8 = vld [vmem:[#allocation5 + $0x158] sm:$0xff] }
  0xd9   :  { %v2309_v10 = vpack.c.bf16 %v756_v8, %v754_v7  ;;  %v788_v7 = vld [vmem:[#allocation5 + $0x258] sm:$0xff] }
  0xdb   :  { %2280 = vmatpush1.bf16.msra.mxu0 %v2279_v49  ;;  %v762_v49 = vld [vmem:[#allocation5 + $0x188] sm:$0xff] }
  0xdc   :  { %2282 = vmatprep.subr.bf16.mxu0 %v2281_v19  ;;  %v764_v19 = vld [vmem:[#allocation5 + $0x198] sm:$0xff] }
  0xdd   :  { %v2317_v21 = vpack.c.bf16 %v764_v19, %v762_v49  ;;  %v796_v49 = vld [vmem:[#allocation5 + $0x298] sm:$0xff] }
  0xdf   :  { %2284 = vmatpush1.bf16.msra.mxu0 %v2283_v29  ;;  %v770_v29 = vld [vmem:[#allocation5 + $0x1c8] sm:$0xff] }
  0xe0   :  { %2286 = vmatprep.subr.bf16.mxu0 %v2285_v30  ;;  %v772_v30 = vld [vmem:[#allocation5 + $0x1d8] sm:$0xff] }
  0xe1   :  { %v2325_v32 = vpack.c.bf16 %v772_v30, %v770_v29  ;;  %v797_v29 = vld [vmem:[#allocation5 + $0x2a0] sm:$0xff]  ;;  %v799_v30 = vld [vmem:[#allocation5 + $0x2b0] sm:$0xff] }
  0xe2   :  { %v2355_v35 = vpack.c.bf16 %v799_v30, %v797_v29  ;;  %v833_v30 = vld [vmem:[#allocation5 + $0x3c0] sm:$0xff] }
  0xe3   :  { %2288 = vmatpush1.bf16.msra.mxu0 %v2287_v39  ;;  %v773_v39 = vld [vmem:[#allocation5 + $0x1e0] sm:$0xff] }
  0xe4   :  { %2290 = vmatprep.subr.bf16.mxu0 %v2289_v40  ;;  %v775_v40 = vld [vmem:[#allocation5 + $0x1f0] sm:$0xff] }
  0xe5   :  { %v2331_v43 = vpack.c.bf16 %v775_v40, %v773_v39  ;;  %v803_v39 = vld [vmem:[#allocation5 + $0x2d0] sm:$0xff]  ;;  %v806_v40 = vld [vmem:[#allocation5 + $0x2e8] sm:$0xff] }
  0xe7   :  { %2292 = vmatpush1.bf16.msra.mxu0 %v2291_v46  ;;  %v3005_v46 = vshrl.u32 %v354_v45, 7  ;;  %v805_v45 = vld [vmem:[#allocation5 + $0x2e0] sm:$0xff] }
  0xe8   :  { %2294 = vmatprep.subr.bf16.mxu0 %v2293_v47 }
  0xe9   :  { %v3008_v47 = vsub.s32 0, %v3005_v46  ;;  %v3016_v50 = vsub.s32 1, %v3005_v46  ;;  %v368_v19 = vsub.s32 3, %v3005_v46  ;;  %v364_v51 = vsub.s32 2, %v3005_v46 }
  0xeb   :  { %2296 = vmatpush1.bf16.msra.mxu0 %v2295_v54  ;;  %v357_v52 = vrot.slane %v3013_v48, %v3008_v47  ;;  %v361_v53 = vrot.slane %v3013_v48, %v3016_v50 }
  0xec   :  { %2298 = vmatprep.subr.bf16.mxu0 %v2297_v56 }
  0xef   :  { %2300 = vmatpush1.bf16.msra.mxu0 %v2299_v61  ;;  %v782_v61 = vld [vmem:[#allocation5 + $0x228] sm:$0xff] }
  0xf0   :  { %2302 = vmatprep.subr.bf16.mxu0 %v2301_v62  ;;  %v784_v62 = vld [vmem:[#allocation5 + $0x238] sm:$0xff] }
  0xf1   :  { %v2337_v2 = vpack.c.bf16 %v784_v62, %v782_v61 }
  0xf3   :  { %2304 = vmatpush1.bf16.msra.mxu0 %v2303_v3  ;;  %v781_v3 = vld [vmem:[#allocation5 + $0x220] sm:$0xff] }
  0xf4   :  { %2306 = vmatprep.subr.bf16.mxu0 %v2305_v4  ;;  %v783_v4 = vld [vmem:[#allocation5 + $0x230] sm:$0xff] }
  0xf5   :  { %v2339_v8 = vpack.c.bf16 %v783_v4, %v781_v3 }
  0xf7   :  { %2308 = vmatpush1.bf16.msra.mxu0 %v2307_v9  ;;  %v2341_v9 = vpack.c.bf16 %v788_v7, %v786_v6  ;;  %v819_v6 = vld [vmem:[#allocation5 + $0x350] sm:$0xff]  ;;  %v822_v7 = vld [vmem:[#allocation5 + $0x368] sm:$0xff] }
  0xf8   :  { %2310 = vmatprep.subr.bf16.mxu0 %v2309_v10  ;;  %v785_v10 = vld [vmem:[#allocation5 + $0x240] sm:$0xff] }
  0xf9   :  { %v2343_v14 = vpack.c.bf16 %v787_v11, %v785_v10  ;;  %v821_v11 = vld [vmem:[#allocation5 + $0x360] sm:$0xff] }
  0xfb   :  { %2312 = vmatpush1.bf16.msra.mxu0 %v2311_v15  ;;  %v2345_v15 = vpack.c.bf16 %v792_v13, %v790_v12  ;;  %v823_v12 = vld [vmem:[#allocation5 + $0x370] sm:$0xff]  ;;  %v826_v13 = vld [vmem:[#allocation5 + $0x388] sm:$0xff] }
  0xfc   :  { %2314 = vmatprep.subr.bf16.mxu0 %v2313_v16  ;;  %v789_v16 = vld [vmem:[#allocation5 + $0x260] sm:$0xff] }
  0xff   :  { %2316 = vmatpush1.bf16.msra.mxu0 %v2315_v20  ;;  %v2347_v20 = vpack.c.bf16 %v791_v17, %v789_v16  ;;  %v825_v17 = vld [vmem:[#allocation5 + $0x380] sm:$0xff] }
 0x100   :  { %2318 = vmatprep.subr.bf16.mxu0 %v2317_v21  ;;  %v2349_v21 = vpack.c.bf16 %v796_v49, %v794_v18  ;;  %v827_v18 = vld [vmem:[#allocation5 + $0x390] sm:$0xff]  ;;  %v830_v49 = vld [vmem:[#allocation5 + $0x3a8] sm:$0xff] }
 0x103   :  { %2320 = vmatpush1.bf16.msra.mxu0 %v2319_v25  ;;  %v369_v25 = vrot.slane %v3013_v48, %v368_v19 }
 0x104   :  { %2322 = vmatprep.subr.bf16.mxu0 %v2321_v26  ;;  %v2351_v26 = vpack.c.bf16 %v795_v23, %v793_v22  ;;  %v829_v23 = vld [vmem:[#allocation5 + $0x3a0] sm:$0xff] }
 0x107   :  { %2324 = vmatpush1.bf16.msra.mxu0 %v2323_v31 }
 0x108   :  { %2326 = vmatprep.subr.bf16.mxu0 %v2325_v32  ;;  %v802_v32 = vld [vmem:[#allocation5 + $0x2c8] sm:$0xff] }
 0x10b   :  { %2328 = vmatpush1.bf16.msra.mxu0 %v2327_v37  ;;  %v2357_v37 = vpack.c.bf16 %v804_v33, %v802_v32  ;;  %v376_v32 = vsub.s32 5, %v3005_v46  ;;  %v365_v33 = vrot.slane %v3013_v48, %v364_v51 }
 0x10c   :  { %2330 = vmatprep.subr.bf16.mxu0 %v2329_v38  ;;  %v801_v38 = vld [vmem:[#allocation5 + $0x2c0] sm:$0xff] }
 0x10f   :  { %2332 = vmatpush1.bf16.msra.mxu0 %v2331_v43  ;;  %v2359_v43 = vpack.c.bf16 %v803_v39, %v801_v38  ;;  %v837_v38 = vld [vmem:[#allocation5 + $0x3e0] sm:$0xff]  ;;  %v839_v39 = vld [vmem:[#allocation5 + $0x3f0] sm:$0xff] }
 0x110   :  { %2334 = vmatprep.subr.bf16.mxu0 %v2333_v44  ;;  %v2361_v44 = vpack.c.bf16 %v808_v41, %v806_v40  ;;  %v377_v40 = vrot.slane %v3013_v48, %v376_v32  ;;  %v1296_v32 = vld [vmem:[#allocation7 + $0xc8] sm:$0xff] }
 0x165   :  { %v471_v54 = vpop.f32.mrb[0].mxu0 }
 0x166   :  { %v472_v55 = vadd.f32 %v471_v54, %v357_v52  ;;  %v473_v56 = vpop.f32.mrb[1].mxu0  ;;  %v807_v52 = vld [vmem:[#allocation5 + $0x2f0] sm:$0xff]  ;;  %v812_v54 = vld [vmem:[#allocation5 + $0x318] sm:$0xff] }
 0x167   :  { %v474_v57 = vadd.f32 %v473_v56, %v361_v53  ;;  %v810_v53 = vld [vmem:[#allocation5 + $0x308] sm:$0xff] }
 0x168   :  { %v697_v60 = vmul.f32 0.2, %v472_v55  ;;  %vm689_vm0 = vcmp.ge.f32.partialorder %v472_v55, 0.0  ;;  %v3026_v27 = vpop.f32.mrb[0].mxu1  ;;  %v2365_v56 = vpack.c.bf16 %v812_v54, %v810_v53  ;;  %v841_v54 = vld [vmem:[#allocation5 + $0x400] sm:$0xff] }
 0x169   :  { %v698_v63 = vmul.f32 0.2, %v474_v57  ;;  %vm690_vm1 = vcmp.ge.f32.partialorder %v474_v57, 0.0  ;;  %v544_v31 = vpop.f32.mrb[1].mxu1  ;;  %v543_v41 = vadd.f32 %v3026_v27, %v365_v33  ;;  %v1300_v33 = vld [vmem:[#allocation7 + $0xe8] sm:$0xff] }
 0x16a   :  { %v705_v5 = vsel %vm689_vm0, %v472_v55, %v697_v60  ;;  %v545_v34 = vadd.f32 %v544_v31, %v369_v25  ;;  %v2363_v55 = vpack.c.bf16 %v807_v52, %v805_v45  ;;  %v816_v60 = vld [vmem:[#allocation5 + $0x338] sm:$0xff]  ;;  %v834_v25 = vld [vmem:[#allocation5 + $0x3c8] sm:$0xff]  ;;  %v835_v31 = vld [vmem:[#allocation5 + $0x3d0] sm:$0xff]  ;;  %v2395_v45 = vpack.c.bf16 %v839_v39, %v837_v38 }
 0x16b   :  { %v706_v1 = vsel %vm690_vm1, %v474_v57, %v698_v63  ;;  %v809_v57 = vld [vmem:[#allocation5 + $0x300] sm:$0xff]  ;;  %v2369_v62 = vpack.c.bf16 %v816_v60, %v814_v59  ;;  %v848_v59 = vld [vmem:[#allocation5 + $0x438] sm:$0xff]  ;;  %vm691_vm3 = vcmp.ge.f32.partialorder %v543_v41, 0.0  ;;  %v2537_v39 = vpack.c.bf16 %v1300_v33, %v1296_v32 }
 0x16c   :  { %1045 = vmatprep.mubr.f32.mxu0 %v706_v1  ;;  %v700_v36 = vmul.f32 0.2, %v545_v34  ;;  %vm692_vm2 = vcmp.ge.f32.partialorder %v545_v34, 0.0  ;;  %v2367_v61 = vpack.c.bf16 %v811_v58, %v809_v57  ;;  %v813_v63 = vld [vmem:[#allocation5 + $0x320] sm:$0xff]  ;;  %v818_v1 = vld [vmem:[#allocation5 + $0x348] sm:$0xff] }
 0x16d   :  { %1046 = vmatmul.mubr.f32.vlgmr.msra.gmra.mrb[4].mxu0 %v705_v5  ;;  %v817_v5 = vld [vmem:[#allocation5 + $0x340] sm:$0xff]  ;;  %v699_v57 = vmul.f32 0.2, %v543_v41  ;;  %v846_v58 = vld [vmem:[#allocation5 + $0x428] sm:$0xff] }
 0x16e   :  { %2336 = vmatpush1.bf16.msra.mxu0 %v2335_v0  ;;  %v708_v42 = vsel %vm692_vm2, %v545_v34, %v700_v36  ;;  %v815_v0 = vld [vmem:[#allocation5 + $0x330] sm:$0xff]  ;;  %v838_v34 = vld [vmem:[#allocation5 + $0x3e8] sm:$0xff]  ;;  %v2391_v36 = vpack.c.bf16 %v835_v31, %v833_v30  ;;  %v857_v38 = vld [vmem:[#allocation5 + $0x480] sm:$0xff] }
 0x16f   :  { %2338 = vmatprep.subr.bf16.mxu0 %v2337_v2  ;;  %1116 = vmatprep.mubr.f32.mxu0 %v708_v42  ;;  %v820_v2 = vld [vmem:[#allocation5 + $0x358] sm:$0xff]  ;;  %v2371_v3 = vpack.c.bf16 %v815_v0, %v813_v63  ;;  %v842_v42 = vld [vmem:[#allocation5 + $0x408] sm:$0xff]  ;;  %v847_v63 = vld [vmem:[#allocation5 + $0x430] sm:$0xff] }
 0x170   :  { %v2373_v4 = vpack.c.bf16 %v820_v2, %v818_v1  ;;  %v707_v1 = vsel %vm691_vm3, %v543_v41, %v699_v57  ;;  %v850_v2 = vld [vmem:[#allocation5 + $0x448] sm:$0xff]  ;;  %v855_v31 = vld [vmem:[#allocation5 + $0x470] sm:$0xff]  ;;  %v1299_v41 = vld [vmem:[#allocation7 + $0xe0] sm:$0xff] }
 0x171   :  { %v861_v57 = vld [vmem:[#allocation5 + $0x4a0] sm:$0xff] }
 0x172   :  { %2340 = vmatpush1.bf16.msra.mxu0 %v2339_v8  ;;  %v824_v8 = vld [vmem:[#allocation5 + $0x378] sm:$0xff]  ;;  %v1327_v33 = vld [vmem:[#allocation7 + $0x1c0] sm:$0xff] }
 0x173   :  { %2342 = vmatprep.subr.bf16.mxu0 %v2341_v9  ;;  %v2375_v9 = vpack.c.bf16 %v819_v6, %v817_v5  ;;  %v2377_v10 = vpack.c.bf16 %v824_v8, %v822_v7  ;;  %v851_v5 = vld [vmem:[#allocation5 + $0x450] sm:$0xff]  ;;  %v1272_v6 = vld [vmem:[#allocation7 + $0x8] sm:$0xff]  ;;  %v1271_v8 = vld [vmem:[#allocation7] sm:$0xff] }
 0x174   :  { %v1276_v7 = vld [vmem:[#allocation7 + $0x28] sm:$0xff] }
 0x176   :  { %2344 = vmatpush1.bf16.msra.mxu0 %v2343_v14  ;;  %v828_v14 = vld [vmem:[#allocation5 + $0x398] sm:$0xff] }
 0x177   :  { %2346 = vmatprep.subr.bf16.mxu0 %v2345_v15  ;;  %v2379_v15 = vpack.c.bf16 %v823_v12, %v821_v11  ;;  %v2381_v16 = vpack.c.bf16 %v828_v14, %v826_v13  ;;  %v1275_v11 = vld [vmem:[#allocation7 + $0x20] sm:$0xff]  ;;  %v1280_v12 = vld [vmem:[#allocation7 + $0x48] sm:$0xff] }
 0x178   :  { %v1284_v13 = vld [vmem:[#allocation7 + $0x68] sm:$0xff] }
 0x17a   :  { %2348 = vmatpush1.bf16.msra.mxu0 %v2347_v20  ;;  %v832_v20 = vld [vmem:[#allocation5 + $0x3b8] sm:$0xff] }
 0x17b   :  { %2350 = vmatprep.subr.bf16.mxu0 %v2349_v21  ;;  %v2383_v21 = vpack.c.bf16 %v827_v18, %v825_v17  ;;  %v2385_v22 = vpack.c.bf16 %v832_v20, %v830_v49  ;;  %v1279_v17 = vld [vmem:[#allocation7 + $0x40] sm:$0xff]  ;;  %v1288_v49 = vld [vmem:[#allocation7 + $0x88] sm:$0xff] }
 0x17c   :  { %v1283_v18 = vld [vmem:[#allocation7 + $0x60] sm:$0xff]  ;;  %v854_v20 = vld [vmem:[#allocation5 + $0x468] sm:$0xff] }
 0x17e   :  { %2352 = vmatpush1.bf16.msra.mxu0 %v2351_v26  ;;  %v836_v26 = vld [vmem:[#allocation5 + $0x3d8] sm:$0xff] }
 0x17f   :  { %2354 = vmatprep.subr.bf16.mxu0 %v2353_v28  ;;  %v2387_v28 = vpack.c.bf16 %v831_v24, %v829_v23  ;;  %v2389_v29 = vpack.c.bf16 %v836_v26, %v834_v25  ;;  %v2531_v23 = vpack.c.bf16 %v1283_v18, %v1279_v17  ;;  %v853_v25 = vld [vmem:[#allocation5 + $0x460] sm:$0xff] }
 0x180   :  { %v869_v18 = vld [vmem:[#allocation5 + $0x4e0] sm:$0xff] }
 0x182   :  { %2356 = vmatpush1.bf16.msra.mxu0 %v2355_v35  ;;  %v840_v35 = vld [vmem:[#allocation5 + $0x3f8] sm:$0xff] }
 0x183   :  { %2358 = vmatprep.subr.bf16.mxu0 %v2357_v37  ;;  %v2393_v37 = vpack.c.bf16 %v840_v35, %v838_v34  ;;  %v858_v34 = vld [vmem:[#allocation5 + $0x488] sm:$0xff]  ;;  %v860_v35 = vld [vmem:[#allocation5 + $0x498] sm:$0xff] }
 0x186   :  { %2360 = vmatpush1.bf16.msra.mxu0 %v2359_v43  ;;  %v844_v43 = vld [vmem:[#allocation5 + $0x418] sm:$0xff] }
 0x187   :  { %2362 = vmatprep.subr.bf16.mxu0 %v2361_v44  ;;  %v2397_v53 = vpack.c.bf16 %v844_v43, %v842_v42  ;;  %v2413_v42 = vpack.c.bf16 %v860_v35, %v858_v34  ;;  %v859_v43 = vld [vmem:[#allocation5 + $0x490] sm:$0xff]  ;;  %v1331_v34 = vld [vmem:[#allocation7 + $0x1e0] sm:$0xff] }
 0x18a   :  { %2364 = vmatpush1.bf16.msra.mxu0 %v2363_v55  ;;  %v843_v55 = vld [vmem:[#allocation5 + $0x410] sm:$0xff] }
 0x18b   :  { %2366 = vmatprep.subr.bf16.mxu0 %v2365_v56  ;;  %v2399_v27 = vpack.c.bf16 %v843_v55, %v841_v54  ;;  %v864_v54 = vld [vmem:[#allocation5 + $0x4b8] sm:$0xff] }
 0x18e   :  { %2368 = vmatpush1.bf16.msra.mxu0 %v2367_v61  ;;  %v2401_v61 = vpack.c.bf16 %v848_v59, %v846_v58 }
 0x18f   :  { %2370 = vmatprep.subr.bf16.mxu0 %v2369_v62  ;;  %v845_v62 = vld [vmem:[#allocation5 + $0x420] sm:$0xff] }
 0x192   :  { %2372 = vmatpush1.bf16.msra.mxu0 %v2371_v3  ;;  %v852_v3 = vld [vmem:[#allocation5 + $0x458] sm:$0xff] }
 0x193   :  { %2374 = vmatprep.subr.bf16.mxu0 %v2373_v4  ;;  %v849_v4 = vld [vmem:[#allocation5 + $0x440] sm:$0xff]  ;;  %v2405_v14 = vpack.c.bf16 %v852_v3, %v850_v2  ;;  %v866_v2 = vld [vmem:[#allocation5 + $0x4c8] sm:$0xff]  ;;  %v868_v3 = vld [vmem:[#allocation5 + $0x4d8] sm:$0xff] }
 0x194   :  { %v2407_v24 = vpack.c.bf16 %v851_v5, %v849_v4 }
 0x196   :  { %2376 = vmatpush1.bf16.msra.mxu0 %v2375_v9  ;;  %v2403_v9 = vpack.c.bf16 %v847_v63, %v845_v62  ;;  %v863_v62 = vld [vmem:[#allocation5 + $0x4b0] sm:$0xff] }
 0x197   :  { %2378 = vmatprep.subr.bf16.mxu0 %v2377_v10  ;;  %v2525_v10 = vpack.c.bf16 %v1276_v7, %v1272_v6  ;;  %v2419_v5 = vpack.c.bf16 %v863_v62, %v861_v57  ;;  %v865_v6 = vld [vmem:[#allocation5 + $0x4c0] sm:$0xff]  ;;  %v1348_v57 = vld [vmem:[#allocation7 + $0x268] sm:$0xff] }
 0x198   :  { %v881_v62 = vld [vmem:[#allocation5 + $0x540] sm:$0xff] }
 0x199   :  { %2526 = vmatprep.subr.bf16.mxu1 %v2525_v10  ;;  %v2421_v10 = vpack.c.bf16 %v868_v3, %v866_v2  ;;  %v1347_v2 = vld [vmem:[#allocation7 + $0x260] sm:$0xff] }
 0x19a   :  { %2380 = vmatpush1.bf16.msra.mxu0 %v2379_v15  ;;  %v2527_v15 = vpack.c.bf16 %v1275_v11, %v1271_v8  ;;  %v1311_v8 = vld [vmem:[#allocation7 + $0x140] sm:$0xff]  ;;  %v867_v11 = vld [vmem:[#allocation5 + $0x4d0] sm:$0xff] }
 0x19b   :  { %2382 = vmatprep.subr.bf16.mxu0 %v2381_v16  ;;  %v2529_v16 = vpack.c.bf16 %v1284_v13, %v1280_v12  ;;  %v1320_v12 = vld [vmem:[#allocation7 + $0x188] sm:$0xff]  ;;  %v2423_v17 = vpack.c.bf16 %v867_v11, %v865_v6  ;;  %v885_v11 = vld [vmem:[#allocation5 + $0x560] sm:$0xff] }
 0x19c   :  { %2528 = vmatpush1.bf16.msra.mxu1 %v2527_v15  ;;  %v1324_v13 = vld [vmem:[#allocation7 + $0x1a8] sm:$0xff]  ;;  %v872_v15 = vld [vmem:[#allocation5 + $0x4f8] sm:$0xff] }
 0x19d   :  { %2530 = vmatprep.subr.bf16.mxu1 %v2529_v16  ;;  %v1356_v6 = vld [vmem:[#allocation7 + $0x2a8] sm:$0xff] }
 0x19e   :  { %2384 = vmatpush1.bf16.msra.mxu0 %v2383_v21  ;;  %v856_v21 = vld [vmem:[#allocation5 + $0x478] sm:$0xff] }
 0x19f   :  { %2386 = vmatprep.subr.bf16.mxu0 %v2385_v22  ;;  %v1292_v22 = vld [vmem:[#allocation7 + $0xa8] sm:$0xff]  ;;  %v2409_v30 = vpack.c.bf16 %v856_v21, %v854_v20  ;;  %v1319_v20 = vld [vmem:[#allocation7 + $0x180] sm:$0xff] }
 0x1a0   :  { %v2533_v26 = vpack.c.bf16 %v1292_v22, %v1288_v49  ;;  %2532 = vmatpush1.bf16.msra.mxu1 %v2531_v23  ;;  %v2549_v49 = vpack.c.bf16 %v1324_v13, %v1320_v12  ;;  %v1323_v21 = vld [vmem:[#allocation7 + $0x1a0] sm:$0xff]  ;;  %v871_v23 = vld [vmem:[#allocation5 + $0x4f0] sm:$0xff] }
 0x1a1   :  { %v1351_v13 = vld [vmem:[#allocation7 + $0x280] sm:$0xff] }
 0x1a2   :  { %2388 = vmatpush1.bf16.msra.mxu0 %v2387_v28  ;;  %v1287_v28 = vld [vmem:[#allocation7 + $0x80] sm:$0xff]  ;;  %2534 = vmatprep.subr.bf16.mxu1 %v2533_v26  ;;  %v874_v26 = vld [vmem:[#allocation5 + $0x508] sm:$0xff] }
 0x1a3   :  { %2390 = vmatprep.subr.bf16.mxu0 %v2389_v29  ;;  %v1291_v29 = vld [vmem:[#allocation7 + $0xa0] sm:$0xff] }
 0x1a5   :  { %v3035_v44 = vpop.f32.mrb[2].mxu0 }
 0x1a6   :  { %2392 = vmatpush1.bf16.msra.mxu0 %v2391_v36  ;;  %v615_v52 = vpop.f32.mrb[3].mxu0  ;;  %v2535_v36 = vpack.c.bf16 %v1291_v29, %v1287_v28  ;;  %v876_v28 = vld [vmem:[#allocation5 + $0x518] sm:$0xff]  ;;  %v2551_v29 = vpack.c.bf16 %v1323_v21, %v1319_v20 }
 0x1a7   :  { %2394 = vmatprep.subr.bf16.mxu0 %v2393_v37  ;;  %v616_v56 = vadd.f32 %v615_v52, %v377_v40  ;;  %v2411_v37 = vpack.c.bf16 %v855_v31, %v853_v25  ;;  %v1295_v40 = vld [vmem:[#allocation7 + $0xc0] sm:$0xff]  ;;  %v1308_v52 = vld [vmem:[#allocation7 + $0x128] sm:$0xff]  ;;  %v2429_v35 = vpack.c.bf16 %v876_v28, %v874_v26  ;;  %v892_v20 = vld [vmem:[#allocation5 + $0x598] sm:$0xff] }
 0x1a8   :  { %2536 = vmatpush1.bf16.msra.mxu1 %v2535_v36  ;;  %v2539_v55 = vpack.c.bf16 %v1299_v41, %v1295_v40  ;;  %v3037_v58 = vpop.f32.mrb[2].mxu1  ;;  %v1332_v25 = vld [vmem:[#allocation7 + $0x1e8] sm:$0xff]  ;;  %v873_v31 = vld [vmem:[#allocation5 + $0x500] sm:$0xff]  ;;  %v875_v36 = vld [vmem:[#allocation5 + $0x510] sm:$0xff]  ;;  %v2555_v41 = vpack.c.bf16 %v1331_v34, %v1327_v33 }
 0x1a9   :  { %v702_v60 = vmul.f32 0.2, %v616_v56  ;;  %vm694_vm4 = vcmp.ge.f32.partialorder %v616_v56, 0.0  ;;  %2538 = vmatprep.subr.bf16.mxu1 %v2537_v39  ;;  %v3039_v63 = vpop.f32.mrb[3].mxu1  ;;  %v878_v39 = vld [vmem:[#allocation5 + $0x528] sm:$0xff]  ;;  %v880_v40 = vld [vmem:[#allocation5 + $0x538] sm:$0xff] }
 0x1aa   :  { %2396 = vmatpush1.bf16.msra.mxu0 %v2395_v45  ;;  %v1304_v45 = vld [vmem:[#allocation7 + $0x108] sm:$0xff]  ;;  %v1363_v26 = vld [vmem:[#allocation7 + $0x2e0] sm:$0xff]  ;;  %v896_v33 = vld [vmem:[#allocation5 + $0x5b8] sm:$0xff] }
 0x1ab   :  { %2398 = vmatprep.subr.bf16.mxu0 %v2397_v53  ;;  %v710_v0 = vsel %vm694_vm4, %v616_v56, %v702_v60  ;;  %v862_v53 = vld [vmem:[#allocation5 + $0x4a8] sm:$0xff]  ;;  %v2415_v56 = vpack.c.bf16 %v859_v43, %v857_v38  ;;  %v2541_v59 = vpack.c.bf16 %v1308_v52, %v1304_v45  ;;  %v1303_v60 = vld [vmem:[#allocation7 + $0x100] sm:$0xff] }
 0x1ac   :  { %2540 = vmatpush1.bf16.msra.mxu1 %v2539_v55  ;;  %v1340_v38 = vld [vmem:[#allocation7 + $0x228] sm:$0xff]  ;;  %v877_v43 = vld [vmem:[#allocation5 + $0x520] sm:$0xff]  ;;  %v879_v55 = vld [vmem:[#allocation5 + $0x530] sm:$0xff] }
 0x1ad   :  { %1117 = vmatmul.mubr.f32.vlgmr.msra.gmra.mrb[4].mxu0 %v707_v1  ;;  %v1316_v1 = vld [vmem:[#allocation7 + $0x168] sm:$0xff]  ;;  %2542 = vmatprep.subr.bf16.mxu1 %v2541_v59  ;;  %v1335_v52 = vld [vmem:[#allocation7 + $0x200] sm:$0xff] }
 0x1ae   :  { %2400 = vmatpush1.bf16.msra.mxu0 %v2399_v27  ;;  %1187 = vmatprep.mubr.f32.mxu0 %v710_v0  ;;  %v1307_v27 = vld [vmem:[#allocation7 + $0x120] sm:$0xff]  ;;  %v1312_v0 = vld [vmem:[#allocation7 + $0x148] sm:$0xff] }
 0x1af   :  { %2402 = vmatprep.subr.bf16.mxu0 %v2401_v61  ;;  %v2417_v61 = vpack.c.bf16 %v864_v54, %v862_v53  ;;  %v2543_v4 = vpack.c.bf16 %v1307_v27, %v1303_v60  ;;  %v2545_v7 = vpack.c.bf16 %v1316_v1, %v1312_v0  ;;  %v1339_v53 = vld [vmem:[#allocation7 + $0x220] sm:$0xff]  ;;  %v2433_v54 = vpack.c.bf16 %v880_v40, %v878_v39  ;;  %v882_v59 = vld [vmem:[#allocation5 + $0x548] sm:$0xff]  ;;  %v884_v60 = vld [vmem:[#allocation5 + $0x558] sm:$0xff] }
 0x1b0   :  { %v2559_v27 = vpack.c.bf16 %v1339_v53, %v1335_v52  ;;  %v1343_v1 = vld [vmem:[#allocation7 + $0x240] sm:$0xff]  ;;  %v2437_v3 = vpack.c.bf16 %v884_v60, %v882_v59  ;;  %v372_v52 = vsub.s32 4, %v3005_v46  ;;  %v898_v53 = vld [vmem:[#allocation5 + $0x5c8] sm:$0xff] }
 0x1b1   :  { %2544 = vmatpush1.bf16.msra.mxu1 %v2543_v4  ;;  %v883_v4 = vld [vmem:[#allocation5 + $0x550] sm:$0xff]  ;;  %v1371_v39 = vld [vmem:[#allocation7 + $0x320] sm:$0xff] }
 0x1b2   :  { %2404 = vmatpush1.bf16.msra.mxu0 %v2403_v9  ;;  %v1315_v9 = vld [vmem:[#allocation7 + $0x160] sm:$0xff]  ;;  %2546 = vmatprep.subr.bf16.mxu1 %v2545_v7  ;;  %v886_v7 = vld [vmem:[#allocation5 + $0x568] sm:$0xff] }
 0x1b3   :  { %2406 = vmatprep.subr.bf16.mxu0 %v2405_v14  ;;  %v870_v14 = vld [vmem:[#allocation5 + $0x4e8] sm:$0xff]  ;;  %v2547_v16 = vpack.c.bf16 %v1315_v9, %v1311_v8  ;;  %v888_v8 = vld [vmem:[#allocation5 + $0x578] sm:$0xff]  ;;  %v2563_v9 = vpack.c.bf16 %v1347_v2, %v1343_v1  ;;  %v1375_v60 = vld [vmem:[#allocation7 + $0x340] sm:$0xff] }
 0x1b4   :  { %v2425_v22 = vpack.c.bf16 %v872_v15, %v870_v14  ;;  %v1355_v14 = vld [vmem:[#allocation7 + $0x2a0] sm:$0xff]  ;;  %v2441_v15 = vpack.c.bf16 %v888_v8, %v886_v7  ;;  %v1384_v1 = vld [vmem:[#allocation7 + $0x388] sm:$0xff] }
 0x1b5   :  { %2548 = vmatpush1.bf16.msra.mxu1 %v2547_v16  ;;  %v887_v16 = vld [vmem:[#allocation5 + $0x570] sm:$0xff]  ;;  %v2567_v21 = vpack.c.bf16 %v1355_v14, %v1351_v13  ;;  %v1388_v2 = vld [vmem:[#allocation7 + $0x3a8] sm:$0xff] }
 0x1b6   :  { %2408 = vmatpush1.bf16.msra.mxu0 %v2407_v24  ;;  %v1328_v24 = vld [vmem:[#allocation7 + $0x1c8] sm:$0xff]  ;;  %2550 = vmatprep.subr.bf16.mxu1 %v2549_v49  ;;  %v2581_v8 = vpack.c.bf16 %v1388_v2, %v1384_v1  ;;  %v931_v1 = vld [vmem:[#allocation5 + $0x6d0] sm:$0xff] }
 0x1b7   :  { %2410 = vmatprep.subr.bf16.mxu0 %v2409_v30  ;;  %v2427_v30 = vpack.c.bf16 %v871_v23, %v869_v18  ;;  %v2553_v32 = vpack.c.bf16 %v1332_v25, %v1328_v24  ;;  %v1364_v18 = vld [vmem:[#allocation7 + $0x2e8] sm:$0xff]  ;;  %v889_v23 = vld [vmem:[#allocation5 + $0x580] sm:$0xff] }
 0x1b8   :  { %v890_v49 = vld [vmem:[#allocation5 + $0x588] sm:$0xff]  ;;  %v1359_v25 = vld [vmem:[#allocation7 + $0x2c0] sm:$0xff] }
 0x1b9   :  { %2552 = vmatpush1.bf16.msra.mxu1 %v2551_v29  ;;  %v2445_v28 = vpack.c.bf16 %v892_v20, %v890_v49  ;;  %v891_v29 = vld [vmem:[#allocation5 + $0x590] sm:$0xff]  ;;  %v2571_v34 = vpack.c.bf16 %v1363_v26, %v1359_v25  ;;  %v906_v14 = vld [vmem:[#allocation5 + $0x608] sm:$0xff] }
 0x1ba   :  { %2412 = vmatpush1.bf16.msra.mxu0 %v2411_v37  ;;  %v1336_v37 = vld [vmem:[#allocation7 + $0x208] sm:$0xff]  ;;  %2554 = vmatprep.subr.bf16.mxu1 %v2553_v32 }
 0x1bb   :  { %2414 = vmatprep.subr.bf16.mxu0 %v2413_v42  ;;  %v2431_v42 = vpack.c.bf16 %v875_v36, %v873_v31  ;;  %v2557_v45 = vpack.c.bf16 %v1340_v38, %v1336_v37  ;;  %v1372_v31 = vld [vmem:[#allocation7 + $0x328] sm:$0xff]  ;;  %v893_v36 = vld [vmem:[#allocation5 + $0x5a0] sm:$0xff] }
 0x1bc   :  { %v894_v32 = vld [vmem:[#allocation5 + $0x5a8] sm:$0xff]  ;;  %v1367_v38 = vld [vmem:[#allocation7 + $0x300] sm:$0xff] }
 0x1bd   :  { %2556 = vmatpush1.bf16.msra.mxu1 %v2555_v41  ;;  %v2449_v40 = vpack.c.bf16 %v896_v33, %v894_v32  ;;  %v895_v41 = vld [vmem:[#allocation5 + $0x5b0] sm:$0xff]  ;;  %v913_v32 = vld [vmem:[#allocation5 + $0x640] sm:$0xff]  ;;  %v934_v2 = vld [vmem:[#allocation5 + $0x6e8] sm:$0xff] }
 0x1be   :  { %2416 = vmatpush1.bf16.msra.mxu0 %v2415_v56  ;;  %v1344_v56 = vld [vmem:[#allocation7 + $0x248] sm:$0xff]  ;;  %2558 = vmatprep.subr.bf16.mxu1 %v2557_v45  ;;  %v915_v33 = vld [vmem:[#allocation5 + $0x650] sm:$0xff] }
 0x1bf   :  { %2418 = vmatprep.subr.bf16.mxu0 %v2417_v61  ;;  %v2435_v61 = vpack.c.bf16 %v879_v55, %v877_v43  ;;  %v2561_v0 = vpack.c.bf16 %v1348_v57, %v1344_v56  ;;  %v1376_v43 = vld [vmem:[#allocation7 + $0x348] sm:$0xff]  ;;  %v2575_v55 = vpack.c.bf16 %v1371_v39, %v1367_v38  ;;  %v2451_v56 = vpack.c.bf16 %v895_v41, %v893_v36  ;;  %v897_v57 = vld [vmem:[#allocation5 + $0x5c0] sm:$0xff]  ;;  %v919_v39 = vld [vmem:[#allocation5 + $0x670] sm:$0xff] }
 0x1c0   :  { %v1380_v45 = vld [vmem:[#allocation7 + $0x368] sm:$0xff]  ;;  %v2471_v36 = vpack.c.bf16 %v915_v33, %v913_v32  ;;  %v917_v38 = vld [vmem:[#allocation5 + $0x660] sm:$0xff]  ;;  %v924_v41 = vld [vmem:[#allocation5 + $0x698] sm:$0xff] }
 0x1c1   :  { %2560 = vmatpush1.bf16.msra.mxu1 %v2559_v27  ;;  %v2577_v59 = vpack.c.bf16 %v1380_v45, %v1376_v43  ;;  %v1379_v27 = vld [vmem:[#allocation7 + $0x360] sm:$0xff] }
 0x1c2   :  { %2420 = vmatpush1.bf16.msra.mxu0 %v2419_v5  ;;  %v1352_v5 = vld [vmem:[#allocation7 + $0x288] sm:$0xff]  ;;  %2562 = vmatprep.subr.bf16.mxu1 %v2561_v0  ;;  %v921_v45 = vld [vmem:[#allocation5 + $0x680] sm:$0xff] }
 0x1c3   :  { %2422 = vmatprep.subr.bf16.mxu0 %v2421_v10  ;;  %v2439_v10 = vpack.c.bf16 %v883_v4, %v881_v62  ;;  %v2565_v12 = vpack.c.bf16 %v1356_v6, %v1352_v5  ;;  %v899_v62 = vld [vmem:[#allocation5 + $0x5d0] sm:$0xff]  ;;  %v902_v4 = vld [vmem:[#allocation5 + $0x5e8] sm:$0xff]  ;;  %v904_v5 = vld [vmem:[#allocation5 + $0x5f8] sm:$0xff]  ;;  %v2579_v6 = vpack.c.bf16 %v1379_v27, %v1375_v60 }
 0x1c4   :  { %v2455_v7 = vpack.c.bf16 %v899_v62, %v897_v57  ;;  %v925_v57 = vld [vmem:[#allocation5 + $0x6a0] sm:$0xff]  ;;  %v930_v60 = vld [vmem:[#allocation5 + $0x6c8] sm:$0xff]  ;;  %v932_v27 = vld [vmem:[#allocation5 + $0x6d8] sm:$0xff] }
 0x1c5   :  { %2564 = vmatpush1.bf16.msra.mxu1 %v2563_v9  ;;  %v2457_v9 = vpack.c.bf16 %v904_v5, %v902_v4  ;;  %v2485_v62 = vpack.c.bf16 %v932_v27, %v930_v60  ;;  %v968_v60 = vld [vmem:[#allocation5 + $0x7f8] sm:$0xff] }
 0x1c6   :  { %2424 = vmatpush1.bf16.msra.mxu0 %v2423_v17  ;;  %v1360_v17 = vld [vmem:[#allocation7 + $0x2c8] sm:$0xff]  ;;  %2566 = vmatprep.subr.bf16.mxu1 %v2565_v12 }
 0x1c7   :  { %2426 = vmatprep.subr.bf16.mxu0 %v2425_v22  ;;  %v2443_v22 = vpack.c.bf16 %v887_v16, %v885_v11  ;;  %v2569_v24 = vpack.c.bf16 %v1364_v18, %v1360_v17  ;;  %v903_v11 = vld [vmem:[#allocation5 + $0x5f0] sm:$0xff]  ;;  %v905_v17 = vld [vmem:[#allocation5 + $0x600] sm:$0xff] }
 0x1c8   :  { %v907_v18 = vld [vmem:[#allocation5 + $0x610] sm:$0xff] }
 0x1c9   :  { %2568 = vmatpush1.bf16.msra.mxu1 %v2567_v21  ;;  %v910_v21 = vld [vmem:[#allocation5 + $0x628] sm:$0xff] }
 0x1ca   :  { %2428 = vmatpush1.bf16.msra.mxu0 %v2427_v30  ;;  %v1368_v30 = vld [vmem:[#allocation7 + $0x308] sm:$0xff]  ;;  %2570 = vmatprep.subr.bf16.mxu1 %v2569_v24  ;;  %v911_v24 = vld [vmem:[#allocation5 + $0x630] sm:$0xff] }
 0x1cb   :  { %2430 = vmatprep.subr.bf16.mxu0 %v2429_v35  ;;  %v2447_v35 = vpack.c.bf16 %v891_v29, %v889_v23  ;;  %v2573_v37 = vpack.c.bf16 %v1372_v31, %v1368_v30  ;;  %v909_v23 = vld [vmem:[#allocation5 + $0x620] sm:$0xff]  ;;  %v916_v29 = vld [vmem:[#allocation5 + $0x658] sm:$0xff] }
 0x1cc   :  { %v2467_v30 = vpack.c.bf16 %v911_v24, %v909_v23  ;;  %v950_v23 = vld [vmem:[#allocation5 + $0x768] sm:$0xff]  ;;  %v952_v24 = vld [vmem:[#allocation5 + $0x778] sm:$0xff] }
 0x1cd   :  { %2572 = vmatpush1.bf16.msra.mxu1 %v2571_v34  ;;  %v918_v34 = vld [vmem:[#allocation5 + $0x668] sm:$0xff] }
 0x1ce   :  { %2432 = vmatpush1.bf16.msra.mxu0 %v2431_v42  ;;  %v384_v42 = vsub.s32 7, %v3005_v46  ;;  %2574 = vmatprep.subr.bf16.mxu1 %v2573_v37 }
 0x1cf   :  { %2434 = vmatprep.subr.bf16.mxu0 %v2433_v54  ;;  %v900_v54 = vld [vmem:[#allocation5 + $0x5d8] sm:$0xff] }
 0x1d0   :  { %v385_v0 = vrot.slane %v3013_v48, %v384_v42  ;;  %v2475_v42 = vpack.c.bf16 %v919_v39, %v917_v38 }
 0x1d1   :  { %2576 = vmatpush1.bf16.msra.mxu1 %v2575_v55 }
 0x1d2   :  { %2436 = vmatpush1.bf16.msra.mxu0 %v2435_v61  ;;  %v2453_v61 = vpack.c.bf16 %v900_v54, %v898_v53  ;;  %2578 = vmatprep.subr.bf16.mxu1 %v2577_v59  ;;  %v687_v12 = vadd.f32 %v3039_v63, %v385_v0  ;;  %v2463_v63 = vpack.c.bf16 %v907_v18, %v905_v17  ;;  %v926_v53 = vld [vmem:[#allocation5 + $0x6a8] sm:$0xff]  ;;  %v928_v54 = vld [vmem:[#allocation5 + $0x6b8] sm:$0xff]  ;;  %v927_v59 = vld [vmem:[#allocation5 + $0x6b0] sm:$0xff] }
 0x1d3   :  { %2438 = vmatprep.subr.bf16.mxu0 %v2437_v3  ;;  %v373_v3 = vrot.slane %v3013_v48, %v372_v52  ;;  %v923_v52 = vld [vmem:[#allocation5 + $0x690] sm:$0xff]  ;;  %v929_v0 = vld [vmem:[#allocation5 + $0x6c0] sm:$0xff] }
 0x1d4   :  { %v704_v49 = vmul.f32 0.2, %v687_v12  ;;  %vm696_vm5 = vcmp.ge.f32.partialorder %v687_v12, 0.0  ;;  %v2479_v55 = vpack.c.bf16 %v923_v52, %v921_v45  ;;  %v2487_v4 = vpack.c.bf16 %v931_v1, %v929_v0  ;;  %v941_v17 = vld [vmem:[#allocation5 + $0x720] sm:$0xff]  ;;  %v943_v18 = vld [vmem:[#allocation5 + $0x730] sm:$0xff]  ;;  %v964_v45 = vld [vmem:[#allocation5 + $0x7d8] sm:$0xff] }
 0x1d5   :  { %v614_v13 = vadd.f32 %v3035_v44, %v373_v3  ;;  %2580 = vmatpush1.bf16.msra.mxu1 %v2579_v6  ;;  %v936_v3 = vld [vmem:[#allocation5 + $0x6f8] sm:$0xff]  ;;  %v933_v6 = vld [vmem:[#allocation5 + $0x6e0] sm:$0xff]  ;;  %v967_v0 = vld [vmem:[#allocation5 + $0x7f0] sm:$0xff] }
 0x1d6   :  { %2440 = vmatpush1.bf16.msra.mxu0 %v2439_v10  ;;  %v901_v10 = vld [vmem:[#allocation5 + $0x5e0] sm:$0xff]  ;;  %2582 = vmatprep.subr.bf16.mxu1 %v2581_v8  ;;  %v712_v25 = vsel %vm696_vm5, %v687_v12, %v704_v49  ;;  %v2489_v5 = vpack.c.bf16 %v936_v3, %v934_v2  ;;  %v938_v8 = vld [vmem:[#allocation5 + $0x708] sm:$0xff] }
 0x1d7   :  { %2442 = vmatprep.subr.bf16.mxu0 %v2441_v15  ;;  %v908_v15 = vld [vmem:[#allocation5 + $0x618] sm:$0xff]  ;;  %v2459_v48 = vpack.c.bf16 %v903_v11, %v901_v10  ;;  %v701_v20 = vmul.f32 0.2, %v614_v13  ;;  %vm693_vm6 = vcmp.ge.f32.partialorder %v614_v13, 0.0  ;;  %v937_v12 = vld [vmem:[#allocation5 + $0x700] sm:$0xff]  ;;  %v946_v49 = vld [vmem:[#allocation5 + $0x748] sm:$0xff] }
 0x1d8   :  { %v2461_v16 = vpack.c.bf16 %v908_v15, %v906_v14  ;;  %v942_v14 = vld [vmem:[#allocation5 + $0x728] sm:$0xff]  ;;  %v944_v15 = vld [vmem:[#allocation5 + $0x738] sm:$0xff] }
 0x1d9   :  { %v709_v26 = vsel %vm693_vm6, %v614_v13, %v701_v20  ;;  %v939_v13 = vld [vmem:[#allocation5 + $0x710] sm:$0xff]  ;;  %v948_v20 = vld [vmem:[#allocation5 + $0x758] sm:$0xff] }
 0x1da   :  { %2444 = vmatpush1.bf16.msra.mxu0 %v2443_v22  ;;  %v912_v22 = vld [vmem:[#allocation5 + $0x638] sm:$0xff] }
 0x1db   :  { %2446 = vmatprep.subr.bf16.mxu0 %v2445_v28  ;;  %v2465_v44 = vpack.c.bf16 %v912_v22, %v910_v21  ;;  %v914_v28 = vld [vmem:[#allocation5 + $0x648] sm:$0xff]  ;;  %v2499_v21 = vpack.c.bf16 %v943_v18, %v941_v17  ;;  %v2501_v22 = vpack.c.bf16 %v948_v20, %v946_v49 }
 0x1dc   :  { %v2469_v31 = vpack.c.bf16 %v916_v29, %v914_v28  ;;  %v949_v28 = vld [vmem:[#allocation5 + $0x760] sm:$0xff]  ;;  %v951_v29 = vld [vmem:[#allocation5 + $0x770] sm:$0xff] }
 0x1dd   :  { %v2507_v32 = vpack.c.bf16 %v951_v29, %v949_v28 }
 0x1de   :  { %2448 = vmatpush1.bf16.msra.mxu0 %v2447_v35  ;;  %v920_v35 = vld [vmem:[#allocation5 + $0x678] sm:$0xff] }
 0x1df   :  { %2450 = vmatprep.subr.bf16.mxu0 %v2449_v40  ;;  %v2473_v37 = vpack.c.bf16 %v920_v35, %v918_v34  ;;  %v922_v40 = vld [vmem:[#allocation5 + $0x688] sm:$0xff]  ;;  %v953_v34 = vld [vmem:[#allocation5 + $0x780] sm:$0xff]  ;;  %v955_v35 = vld [vmem:[#allocation5 + $0x790] sm:$0xff] }
 0x1e0   :  { %v2477_v43 = vpack.c.bf16 %v924_v41, %v922_v40  ;;  %v2511_v38 = vpack.c.bf16 %v955_v35, %v953_v34  ;;  %v957_v40 = vld [vmem:[#allocation5 + $0x7a0] sm:$0xff]  ;;  %v959_v41 = vld [vmem:[#allocation5 + $0x7b0] sm:$0xff]  ;;  %v1294_v34 = vld [vmem:[#allocation7 + $0xb8] sm:$0xff] }
 0x1e1   :  { %v2515_v52 = vpack.c.bf16 %v959_v41, %v957_v40  ;;  %v1302_v40 = vld [vmem:[#allocation7 + $0xf8] sm:$0xff] }
 0x1e2   :  { %2452 = vmatpush1.bf16.msra.mxu0 %v2451_v56  ;;  %v2481_v56 = vpack.c.bf16 %v928_v54, %v926_v53  ;;  %v961_v54 = vld [vmem:[#allocation5 + $0x7c0] sm:$0xff] }
 0x1e3   :  { %2454 = vmatprep.subr.bf16.mxu0 %v2453_v61  ;;  %v2483_v61 = vpack.c.bf16 %v927_v59, %v925_v57  ;;  %v966_v59 = vld [vmem:[#allocation5 + $0x7e8] sm:$0xff] }
 0x1e6   :  { %2456 = vmatpush1.bf16.msra.mxu0 %v2455_v7  ;;  %v935_v7 = vld [vmem:[#allocation5 + $0x6f0] sm:$0xff] }
 0x1e7   :  { %2458 = vmatprep.subr.bf16.mxu0 %v2457_v9  ;;  %v940_v9 = vld [vmem:[#allocation5 + $0x718] sm:$0xff]  ;;  %v2491_v10 = vpack.c.bf16 %v935_v7, %v933_v6  ;;  %v1387_v6 = vld [vmem:[#allocation7 + $0x3a0] sm:$0xff] }
 0x1e8   :  { %v2493_v11 = vpack.c.bf16 %v940_v9, %v938_v8  ;;  %v1392_v8 = vld [vmem:[#allocation7 + $0x3c8] sm:$0xff] }
 0x1e9   :  { %v1396_v9 = vld [vmem:[#allocation7 + $0x3e8] sm:$0xff] }
 0x1ea   :  { %2460 = vmatpush1.bf16.msra.mxu0 %v2459_v48  ;;  %v2495_v48 = vpack.c.bf16 %v939_v13, %v937_v12  ;;  %v1395_v12 = vld [vmem:[#allocation7 + $0x3e0] sm:$0xff] }
 0x1eb   :  { %2462 = vmatprep.subr.bf16.mxu0 %v2461_v16  ;;  %v2497_v16 = vpack.c.bf16 %v944_v15, %v942_v14  ;;  %v1278_v14 = vld [vmem:[#allocation7 + $0x38] sm:$0xff] }
 0x1ed   :  { %1188 = vmatmul.mubr.f32.vlgmr.msra.gmra.mrb[4].mxu0 %v709_v26  ;;  %v2505_v26 = vpack.c.bf16 %v952_v24, %v950_v23  ;;  %v1282_v23 = vld [vmem:[#allocation7 + $0x58] sm:$0xff] }
 0x1ee   :  { %2464 = vmatpush1.bf16.msra.mxu0 %v2463_v63  ;;  %1258 = vmatprep.mubr.f32.mxu0 %v712_v25  ;;  %v945_v63 = vld [vmem:[#allocation5 + $0x740] sm:$0xff]  ;;  %v1286_v24 = vld [vmem:[#allocation7 + $0x78] sm:$0xff] }
 0x1ef   :  { %2466 = vmatprep.subr.bf16.mxu0 %v2465_v44  ;;  %v947_v44 = vld [vmem:[#allocation5 + $0x750] sm:$0xff]  ;;  %v2593_v29 = vpack.c.bf16 %v1286_v24, %v1282_v23 }
 0x1f0   :  { %v2503_v25 = vpack.c.bf16 %v947_v44, %v945_v63  ;;  %v1277_v63 = vld [vmem:[#allocation7 + $0x30] sm:$0xff] }
 0x1f2   :  { %2468 = vmatpush1.bf16.msra.mxu0 %v2467_v30  ;;  %v954_v30 = vld [vmem:[#allocation5 + $0x788] sm:$0xff] }
 0x1f3   :  { %2470 = vmatprep.subr.bf16.mxu0 %v2469_v31  ;;  %v956_v31 = vld [vmem:[#allocation5 + $0x798] sm:$0xff] }
 0x1f4   :  { %v2509_v33 = vpack.c.bf16 %v956_v31, %v954_v30  ;;  %v1281_v30 = vld [vmem:[#allocation7 + $0x50] sm:$0xff] }
 0x1f5   :  { %v1285_v31 = vld [vmem:[#allocation7 + $0x70] sm:$0xff] }
 0x1f6   :  { %2472 = vmatpush1.bf16.msra.mxu0 %v2471_v36  ;;  %v958_v36 = vld [vmem:[#allocation5 + $0x7a8] sm:$0xff]  ;;  %v2595_v35 = vpack.c.bf16 %v1285_v31, %v1281_v30 }
 0x1f7   :  { %2474 = vmatprep.subr.bf16.mxu0 %v2473_v37  ;;  %v960_v37 = vld [vmem:[#allocation5 + $0x7b8] sm:$0xff] }
 0x1f8   :  { %v2513_v39 = vpack.c.bf16 %v960_v37, %v958_v36  ;;  %v1289_v37 = vld [vmem:[#allocation7 + $0x90] sm:$0xff] }
 0x1fa   :  { %2476 = vmatpush1.bf16.msra.mxu0 %v2475_v42  ;;  %v380_v42 = vsub.s32 6, %v3005_v46  ;;  %v1787_v46 = vld [vmem:[%s3139_s9 + $0x8] sm:$0xff] }
 0x1fb   :  { %2478 = vmatprep.subr.bf16.mxu0 %v2477_v43  ;;  %v962_v43 = vld [vmem:[#allocation5 + $0x7c8] sm:$0xff] }
 0x1fc   :  { %v2517_v53 = vpack.c.bf16 %v964_v45, %v962_v43  ;;  %v1297_v43 = vld [vmem:[#allocation7 + $0xd0] sm:$0xff] }
 0x1fd   :  { %v1301_v45 = vld [vmem:[#allocation7 + $0xf0] sm:$0xff] }
 0x1fe   :  { %2480 = vmatpush1.bf16.msra.mxu0 %v2479_v55  ;;  %v963_v55 = vld [vmem:[#allocation5 + $0x7d0] sm:$0xff] }
 0x1ff   :  { %2482 = vmatprep.subr.bf16.mxu0 %v2481_v56  ;;  %v2765_v56 = vld [vmem:[%s3132_s2] sm:$0xff]  ;;  %v2519_v27 = vpack.c.bf16 %v963_v55, %v961_v54  ;;  %v2603_v54 = vpack.c.bf16 %v1301_v45, %v1297_v43 }
 0x200   :  { %v381_v57 = vrot.slane %v2765_v56, %v380_v42  ;;  %v1305_v56 = vld [vmem:[#allocation7 + $0x110] sm:$0xff] }
 0x202   :  { %2484 = vmatpush1.bf16.msra.mxu0 %v2483_v61  ;;  %v2521_v61 = vpack.c.bf16 %v968_v60, %v966_v59  ;;  %v685_v1 = vadd.f32 %v3037_v58, %v381_v57  ;;  %v1274_v58 = vld [vmem:[#allocation7 + $0x18] sm:$0xff]  ;;  %v1309_v57 = vld [vmem:[#allocation7 + $0x130] sm:$0xff] }
 0x203   :  { %2486 = vmatprep.subr.bf16.mxu0 %v2485_v62  ;;  %v965_v62 = vld [vmem:[#allocation5 + $0x7e0] sm:$0xff]  ;;  %v2589_v15 = vpack.c.bf16 %v1278_v14, %v1274_v58  ;;  %v1314_v59 = vld [vmem:[#allocation7 + $0x158] sm:$0xff] }
 0x204   :  { %v2523_v2 = vpack.c.bf16 %v967_v0, %v965_v62  ;;  %v703_v3 = vmul.f32 0.2, %v685_v1  ;;  %vm695_vm7 = vcmp.ge.f32.partialorder %v685_v1, 0.0  ;;  %v1318_v60 = vld [vmem:[#allocation7 + $0x178] sm:$0xff]  ;;  %v1313_v62 = vld [vmem:[#allocation7 + $0x150] sm:$0xff] }
 0x205   :  { %v1317_v0 = vld [vmem:[#allocation7 + $0x170] sm:$0xff]  ;;  %v1342_v58 = vld [vmem:[#allocation7 + $0x238] sm:$0xff] }
 0x206   :  { %2488 = vmatpush1.bf16.msra.mxu0 %v2487_v4  ;;  %v711_v4 = vsel %vm695_vm7, %v685_v1, %v703_v3  ;;  %v1322_v1 = vld [vmem:[#allocation7 + $0x198] sm:$0xff]  ;;  %v2611_v3 = vpack.c.bf16 %v1317_v0, %v1313_v62 }
 0x207   :  { %2490 = vmatprep.subr.bf16.mxu0 %v2489_v5  ;;  %v1383_v5 = vld [vmem:[#allocation7 + $0x380] sm:$0xff] }
 0x208   :  { %v2583_v7 = vpack.c.bf16 %v1387_v6, %v1383_v5  ;;  %v1321_v5 = vld [vmem:[#allocation7 + $0x190] sm:$0xff] }
 0x209   :  { %v1325_v6 = vld [vmem:[#allocation7 + $0x1b0] sm:$0xff] }
 0x20a   :  { %2492 = vmatpush1.bf16.msra.mxu0 %v2491_v10  ;;  %2584 = vmatpush1.bf16.msra.mxu1 %v2583_v7  ;;  %v2585_v10 = vpack.c.bf16 %v1396_v9, %v1392_v8  ;;  %v1330_v7 = vld [vmem:[#allocation7 + $0x1d8] sm:$0xff]  ;;  %v2615_v9 = vpack.c.bf16 %v1325_v6, %v1321_v5 }
 0x20b   :  { %2494 = vmatprep.subr.bf16.mxu0 %v2493_v11  ;;  %v1391_v11 = vld [vmem:[#allocation7 + $0x3c0] sm:$0xff]  ;;  %v1334_v8 = vld [vmem:[#allocation7 + $0x1f8] sm:$0xff] }
 0x20c   :  { %v2587_v13 = vpack.c.bf16 %v1395_v12, %v1391_v11  ;;  %2586 = vmatprep.subr.bf16.mxu1 %v2585_v10  ;;  %v2617_v10 = vpack.c.bf16 %v1334_v8, %v1330_v7  ;;  %v1329_v11 = vld [vmem:[#allocation7 + $0x1d0] sm:$0xff]  ;;  %v1575_v7 = vld [vmem:[#allocation8] sm:$0xff]  ;;  %v1576_v8 = vld [vmem:[#allocation8 + $0x8] sm:$0xff] }
 0x20d   :  { %v1333_v12 = vld [vmem:[#allocation7 + $0x1f0] sm:$0xff] }
 0x20e   :  { %2496 = vmatpush1.bf16.msra.mxu0 %v2495_v48  ;;  %2588 = vmatpush1.bf16.msra.mxu1 %v2587_v13  ;;  %v969_v48 = vld [vmem:[%s3134_s4] sm:$0x3]  ;;  %v2619_v14 = vpack.c.bf16 %v1333_v12, %v1329_v11  ;;  %v2655_v11 = vpack.c.bf16 %v1576_v8, %v1575_v7 }
 0x20f   :  { %2498 = vmatprep.subr.bf16.mxu0 %v2497_v16  ;;  %2590 = vmatprep.subr.bf16.mxu1 %v2589_v15  ;;  %v974_v16 = vrot.slane %v969_v48, %v3008_v47  ;;  %v978_v17 = vrot.slane %v969_v48, %v3016_v50  ;;  %v1338_v13 = vld [vmem:[#allocation7 + $0x218] sm:$0xff]  ;;  %v1337_v48 = vld [vmem:[#allocation7 + $0x210] sm:$0xff] }
 0x210   :  { %v2621_v15 = vpack.c.bf16 %v1342_v58, %v1338_v13  ;;  %v1577_v13 = vld [vmem:[#allocation8 + $0x10] sm:$0xff]  ;;  %v1578_v58 = vld [vmem:[#allocation8 + $0x18] sm:$0xff] }
 0x211   :  { %v1626_v7 = vld [vmem:[#allocation8 + $0x198] sm:$0xff] }
 0x212   :  { %2500 = vmatpush1.bf16.msra.mxu0 %v2499_v21 }
 0x213   :  { %2502 = vmatprep.subr.bf16.mxu0 %v2501_v22  ;;  %v1273_v22 = vld [vmem:[#allocation7 + $0x10] sm:$0xff] }
 0x216   :  { %2504 = vmatpush1.bf16.msra.mxu0 %v2503_v25 }
 0x217   :  { %2506 = vmatprep.subr.bf16.mxu0 %v2505_v26  ;;  %v2591_v26 = vpack.c.bf16 %v1277_v63, %v1273_v22  ;;  %v1349_v22 = vld [vmem:[#allocation7 + $0x270] sm:$0xff]  ;;  %v1354_v63 = vld [vmem:[#allocation7 + $0x298] sm:$0xff] }
 0x21a   :  { %2508 = vmatpush1.bf16.msra.mxu0 %v2507_v32 }
 0x21b   :  { %2510 = vmatprep.subr.bf16.mxu0 %v2509_v33  ;;  %v1290_v33 = vld [vmem:[#allocation7 + $0x98] sm:$0xff] }
 0x21c   :  { %v2597_v36 = vpack.c.bf16 %v1294_v34, %v1290_v33  ;;  %v1361_v33 = vld [vmem:[#allocation7 + $0x2d0] sm:$0xff] }
 0x21d   :  { %v1365_v34 = vld [vmem:[#allocation7 + $0x2f0] sm:$0xff] }
 0x21e   :  { %2512 = vmatpush1.bf16.msra.mxu0 %v2511_v38  ;;  %v1293_v38 = vld [vmem:[#allocation7 + $0xb0] sm:$0xff] }
 0x21f   :  { %2514 = vmatprep.subr.bf16.mxu0 %v2513_v39  ;;  %v1298_v39 = vld [vmem:[#allocation7 + $0xd8] sm:$0xff]  ;;  %v2599_v41 = vpack.c.bf16 %v1293_v38, %v1289_v37  ;;  %v2635_v37 = vpack.c.bf16 %v1365_v34, %v1361_v33  ;;  %v1585_v34 = vld [vmem:[#allocation8 + $0x50] sm:$0xff] }
 0x220   :  { %v2601_v42 = vpack.c.bf16 %v1302_v40, %v1298_v39  ;;  %v1369_v39 = vld [vmem:[#allocation7 + $0x310] sm:$0xff] }
 0x221   :  { %v1373_v40 = vld [vmem:[#allocation7 + $0x330] sm:$0xff] }
 0x222   :  { %2516 = vmatpush1.bf16.msra.mxu0 %v2515_v52  ;;  %v1306_v52 = vld [vmem:[#allocation7 + $0x118] sm:$0xff]  ;;  %v2639_v43 = vpack.c.bf16 %v1373_v40, %v1369_v39  ;;  %v1587_v40 = vld [vmem:[#allocation8 + $0x60] sm:$0xff] }
 0x223   :  { %2518 = vmatprep.subr.bf16.mxu0 %v2517_v53  ;;  %v1310_v53 = vld [vmem:[#allocation7 + $0x138] sm:$0xff] }
 0x224   :  { %v2605_v55 = vpack.c.bf16 %v1310_v53, %v1306_v52  ;;  %v1377_v52 = vld [vmem:[#allocation7 + $0x350] sm:$0xff] }
 0x225   :  { %v1381_v53 = vld [vmem:[#allocation7 + $0x370] sm:$0xff] }
 0x226   :  { %2520 = vmatpush1.bf16.msra.mxu0 %v2519_v27  ;;  %v2607_v27 = vpack.c.bf16 %v1309_v57, %v1305_v56  ;;  %v2643_v56 = vpack.c.bf16 %v1381_v53, %v1377_v52  ;;  %v1589_v53 = vld [vmem:[#allocation8 + $0x70] sm:$0xff] }
 0x227   :  { %2522 = vmatprep.subr.bf16.mxu0 %v2521_v61  ;;  %v2609_v61 = vpack.c.bf16 %v1318_v60, %v1314_v59  ;;  %v1385_v59 = vld [vmem:[#allocation7 + $0x390] sm:$0xff] }
 0x228   :  { %v1389_v60 = vld [vmem:[#allocation7 + $0x3b0] sm:$0xff] }
 0x229   :  { %v2647_v62 = vpack.c.bf16 %v1389_v60, %v1385_v59  ;;  %v3064_v60 = vld [vmem:[%s3136_s6] sm:$0xf] }
 0x22a   :  { %2524 = vmatpush1.bf16.msra.mxu0 %v2523_v2  ;;  %v1326_v2 = vld [vmem:[#allocation7 + $0x1b8] sm:$0xff] }
 0x22d   :  { %1259 = vmatmul.mubr.f32.vlgmr.msra.gmra.mrb[4].mxu0 %v711_v4  ;;  %v2613_v4 = vpack.c.bf16 %v1326_v2, %v1322_v1  ;;  %v1393_v1 = vld [vmem:[#allocation7 + $0x3d0] sm:$0xff] }
 0x22e   :  { %v1397_v2 = vld [vmem:[#allocation7 + $0x3f0] sm:$0xff] }
 0x22f   :  { %v2651_v5 = vpack.c.bf16 %v1397_v2, %v1393_v1 }
 0x300   :  { %v1260_v18 = vpop.f32.mrb[4].mxu0 }
 0x301   :  { %v2741_v49 = vadd.f32 %v1260_v18, %v974_v16  ;;  %v1262_v20 = vpop.f32.mrb[5].mxu0  ;;  %v1341_v16 = vld [vmem:[#allocation7 + $0x230] sm:$0xff]  ;;  %v1350_v18 = vld [vmem:[#allocation7 + $0x278] sm:$0xff] }
 0x302   :  { %v2742_v21 = vadd.f32 %v1262_v20, %v978_v17  ;;  %v1346_v17 = vld [vmem:[#allocation7 + $0x258] sm:$0xff] }
 0x303   :  { %v1267_v44 = vmul.f32 0.2, %v2741_v49  ;;  %vm1265_vm8 = vcmp.ge.f32.partialorder %v2741_v49, 0.0  ;;  %v2625_v20 = vpack.c.bf16 %v1350_v18, %v1346_v17  ;;  %v1579_v17 = vld [vmem:[#allocation8 + $0x20] sm:$0xff]  ;;  %v1580_v18 = vld [vmem:[#allocation8 + $0x28] sm:$0xff] }
 0x304   :  { %v1268_v25 = vmul.f32 0.2, %v2742_v21  ;;  %vm1266_vm9 = vcmp.ge.f32.partialorder %v2742_v21, 0.0 }
 0x305   :  { %v3057_v32 = vsel %vm1265_vm8, %v2741_v49, %v1267_v44  ;;  %v2623_v49 = vpack.c.bf16 %v1341_v16, %v1337_v48  ;;  %v1358_v44 = vld [vmem:[#allocation7 + $0x2b8] sm:$0xff]  ;;  %v2659_v48 = vpack.c.bf16 %v1578_v58, %v1577_v13  ;;  %v1628_v58 = vld [vmem:[#allocation8 + $0x1a8] sm:$0xff] }
 0x306   :  { %v1270_v28 = vsel %vm1266_vm9, %v2742_v21, %v1268_v25  ;;  %v1345_v21 = vld [vmem:[#allocation7 + $0x250] sm:$0xff]  ;;  %v2629_v24 = vpack.c.bf16 %v1358_v44, %v1354_v63  ;;  %v1582_v44 = vld [vmem:[#allocation8 + $0x38] sm:$0xff] }
 0x307   :  { %1485 = vmatprep.mubr.f32.mxu1 %v1270_v28  ;;  %v2627_v23 = vpack.c.bf16 %v1349_v22, %v1345_v21  ;;  %v1353_v25 = vld [vmem:[#allocation7 + $0x290] sm:$0xff]  ;;  %v2663_v21 = vpack.c.bf16 %v1580_v18, %v1579_v17  ;;  %v1630_v18 = vld [vmem:[#allocation8 + $0x1b8] sm:$0xff] }
 0x308   :  { %1486 = vmatmul.mubr.f32.vlgmr.msra.gmra.mrb[4].mxu1 %v3057_v32  ;;  %v1581_v63 = vld [vmem:[#allocation8 + $0x30] sm:$0xff] }
 0x309   :  { %2592 = vmatpush1.bf16.msra.mxu1 %v2591_v26  ;;  %1556 = vmatprep.mubr.f32.mxu1 %v1270_v28  ;;  %v1357_v26 = vld [vmem:[#allocation7 + $0x2b0] sm:$0xff]  ;;  %v1362_v28 = vld [vmem:[#allocation7 + $0x2d8] sm:$0xff] }
 0x30a   :  { %2594 = vmatprep.subr.bf16.mxu1 %v2593_v29  ;;  %v1366_v29 = vld [vmem:[#allocation7 + $0x2f8] sm:$0xff]  ;;  %v2631_v30 = vpack.c.bf16 %v1357_v26, %v1353_v25  ;;  %v2667_v25 = vpack.c.bf16 %v1582_v44, %v1581_v63  ;;  %v1583_v26 = vld [vmem:[#allocation8 + $0x40] sm:$0xff]  ;;  %v1629_v17 = vld [vmem:[#allocation8 + $0x1b0] sm:$0xff] }
 0x30b   :  { %v2633_v31 = vpack.c.bf16 %v1366_v29, %v1362_v28  ;;  %v1584_v28 = vld [vmem:[#allocation8 + $0x48] sm:$0xff]  ;;  %v1601_v29 = vld [vmem:[#allocation8 + $0xd0] sm:$0xff]  ;;  %v1631_v63 = vld [vmem:[#allocation8 + $0x1c0] sm:$0xff] }
 0x30c   :  { %v1632_v44 = vld [vmem:[#allocation8 + $0x1c8] sm:$0xff] }
 0x30d   :  { %2596 = vmatpush1.bf16.msra.mxu1 %v2595_v35  ;;  %v1370_v35 = vld [vmem:[#allocation7 + $0x318] sm:$0xff] }
 0x30e   :  { %2598 = vmatprep.subr.bf16.mxu1 %v2597_v36  ;;  %v1374_v36 = vld [vmem:[#allocation7 + $0x338] sm:$0xff] }
 0x30f   :  { %v2637_v38 = vpack.c.bf16 %v1374_v36, %v1370_v35  ;;  %v1586_v35 = vld [vmem:[#allocation8 + $0x58] sm:$0xff] }
 0x310   :  { %v2675_v36 = vpack.c.bf16 %v1586_v35, %v1585_v34  ;;  %v1635_v34 = vld [vmem:[#allocation8 + $0x1e0] sm:$0xff]  ;;  %v1636_v35 = vld [vmem:[#allocation8 + $0x1e8] sm:$0xff] }
 0x311   :  { %2600 = vmatpush1.bf16.msra.mxu1 %v2599_v41  ;;  %v1378_v41 = vld [vmem:[#allocation7 + $0x358] sm:$0xff] }
 0x312   :  { %2602 = vmatprep.subr.bf16.mxu1 %v2601_v42  ;;  %v1382_v42 = vld [vmem:[#allocation7 + $0x378] sm:$0xff] }
 0x313   :  { %v2641_v45 = vpack.c.bf16 %v1382_v42, %v1378_v41  ;;  %v1588_v41 = vld [vmem:[#allocation8 + $0x68] sm:$0xff] }
 0x314   :  { %v2679_v42 = vpack.c.bf16 %v1588_v41, %v1587_v40  ;;  %v1637_v40 = vld [vmem:[#allocation8 + $0x1f0] sm:$0xff]  ;;  %v1638_v41 = vld [vmem:[#allocation8 + $0x1f8] sm:$0xff] }
 0x315   :  { %2604 = vmatpush1.bf16.msra.mxu1 %v2603_v54  ;;  %v1386_v54 = vld [vmem:[#allocation7 + $0x398] sm:$0xff] }
 0x316   :  { %2606 = vmatprep.subr.bf16.mxu1 %v2605_v55  ;;  %v1390_v55 = vld [vmem:[#allocation7 + $0x3b8] sm:$0xff] }
 0x317   :  { %v2645_v57 = vpack.c.bf16 %v1390_v55, %v1386_v54  ;;  %v1590_v54 = vld [vmem:[#allocation8 + $0x78] sm:$0xff] }
 0x318   :  { %v2683_v55 = vpack.c.bf16 %v1590_v54, %v1589_v53  ;;  %v1412_v54 = vrot.slane %v3064_v60, %v364_v51  ;;  %v1786_v51 = vld [vmem:[%s3139_s9] sm:$0xff] }
 0x319   :  { %2608 = vmatpush1.bf16.msra.mxu1 %v2607_v27  ;;  %v1394_v27 = vld [vmem:[#allocation7 + $0x3d8] sm:$0xff] }
 0x31a   :  { %2610 = vmatprep.subr.bf16.mxu1 %v2609_v61  ;;  %v1398_v61 = vld [vmem:[#allocation7 + $0x3f8] sm:$0xff] }
 0x31b   :  { %v2649_v0 = vpack.c.bf16 %v1398_v61, %v1394_v27  ;;  %v1404_v27 = vrot.slane %v3064_v60, %v3008_v47  ;;  %v1408_v61 = vrot.slane %v3064_v60, %v3016_v50  ;;  %v1610_v47 = vld [vmem:[#allocation8 + $0x118] sm:$0xff]  ;;  %v1627_v50 = vld [vmem:[#allocation8 + $0x1a0] sm:$0xff] }
 0x31d   :  { %2612 = vmatpush1.bf16.msra.mxu1 %v2611_v3  ;;  %v1591_v3 = vld [vmem:[#allocation8 + $0x80] sm:$0xff] }
 0x31e   :  { %2614 = vmatprep.subr.bf16.mxu1 %v2613_v4  ;;  %v1592_v4 = vld [vmem:[#allocation8 + $0x88] sm:$0xff] }
 0x31f   :  { %v2653_v6 = vpack.c.bf16 %v1592_v4, %v1591_v3  ;;  %v1607_v3 = vld [vmem:[#allocation8 + $0x100] sm:$0xff]  ;;  %v1608_v4 = vld [vmem:[#allocation8 + $0x108] sm:$0xff] }
 0x321   :  { %2616 = vmatpush1.bf16.msra.mxu1 %v2615_v9  ;;  %v1593_v9 = vld [vmem:[#allocation8 + $0x90] sm:$0xff] }
 0x322   :  { %2618 = vmatprep.subr.bf16.mxu1 %v2617_v10  ;;  %v1594_v10 = vld [vmem:[#allocation8 + $0x98] sm:$0xff] }
 0x323   :  { %v2657_v12 = vpack.c.bf16 %v1594_v10, %v1593_v9  ;;  %v2687_v9 = vpack.c.bf16 %v1608_v4, %v1607_v3  ;;  %v1789_v3 = vld [vmem:[%s3139_s9 + $0x18] sm:$0xff] }
 0x325   :  { %2620 = vmatpush1.bf16.msra.mxu1 %v2619_v14  ;;  %v1595_v14 = vld [vmem:[#allocation8 + $0xa0] sm:$0xff] }
 0x326   :  { %2622 = vmatprep.subr.bf16.mxu1 %v2621_v15  ;;  %v1596_v15 = vld [vmem:[#allocation8 + $0xa8] sm:$0xff] }
 0x327   :  { %v2661_v16 = vpack.c.bf16 %v1596_v15, %v1595_v14  ;;  %v2693_v15 = vpack.c.bf16 %v1628_v58, %v1627_v50  ;;  %v1797_v50 = vld [vmem:[%s3139_s9 + $0x58] sm:$0xff] }
 0x329   :  { %2624 = vmatpush1.bf16.msra.mxu1 %v2623_v49  ;;  %v1597_v49 = vld [vmem:[#allocation8 + $0xb0] sm:$0xff] }
 0x32a   :  { %2626 = vmatprep.subr.bf16.mxu1 %v2625_v20  ;;  %v1598_v20 = vld [vmem:[#allocation8 + $0xb8] sm:$0xff] }
 0x32b   :  { %v2665_v22 = vpack.c.bf16 %v1598_v20, %v1597_v49  ;;  %v2697_v20 = vpack.c.bf16 %v1630_v18, %v1629_v17  ;;  %v1801_v17 = vld [vmem:[%s3139_s9 + $0x78] sm:$0xff] }
 0x32d   :  { %2628 = vmatpush1.bf16.msra.mxu1 %v2627_v23  ;;  %v1599_v23 = vld [vmem:[#allocation8 + $0xc0] sm:$0xff] }
 0x32e   :  { %2630 = vmatprep.subr.bf16.mxu1 %v2629_v24  ;;  %v1600_v24 = vld [vmem:[#allocation8 + $0xc8] sm:$0xff] }
 0x331   :  { %2632 = vmatpush1.bf16.msra.mxu1 %v2631_v30  ;;  %v1602_v30 = vld [vmem:[#allocation8 + $0xd8] sm:$0xff] }
 0x332   :  { %2634 = vmatprep.subr.bf16.mxu1 %v2633_v31  ;;  %v2671_v31 = vpack.c.bf16 %v1584_v28, %v1583_v26  ;;  %v2673_v33 = vpack.c.bf16 %v1602_v30, %v1601_v29  ;;  %v1633_v26 = vld [vmem:[#allocation8 + $0x1d0] sm:$0xff]  ;;  %v1634_v28 = vld [vmem:[#allocation8 + $0x1d8] sm:$0xff] }
 0x333   :  { %v2705_v30 = vpack.c.bf16 %v1634_v28, %v1633_v26  ;;  %v1890_v26 = vld [vmem:[#allocation2] ss:$0 sm:$0xff] }
 0x335   :  { %2636 = vmatpush1.bf16.msra.mxu1 %v2635_v37  ;;  %v1603_v37 = vld [vmem:[#allocation8 + $0xe0] sm:$0xff] }
 0x336   :  { %2638 = vmatprep.subr.bf16.mxu1 %v2637_v38  ;;  %v1604_v38 = vld [vmem:[#allocation8 + $0xe8] sm:$0xff] }
 0x337   :  { %v2677_v39 = vpack.c.bf16 %v1604_v38, %v1603_v37  ;;  %v2709_v37 = vpack.c.bf16 %v1636_v35, %v1635_v34  ;;  %v1619_v38 = vld [vmem:[#allocation8 + $0x160] sm:$0xff] }
 0x339   :  { %2640 = vmatpush1.bf16.msra.mxu1 %v2639_v43  ;;  %v1605_v43 = vld [vmem:[#allocation8 + $0xf0] sm:$0xff] }
 0x33a   :  { %2642 = vmatprep.subr.bf16.mxu1 %v2641_v45  ;;  %v1606_v45 = vld [vmem:[#allocation8 + $0xf8] sm:$0xff] }
 0x33b   :  { %v2681_v52 = vpack.c.bf16 %v1606_v45, %v1605_v43  ;;  %v2713_v43 = vpack.c.bf16 %v1638_v41, %v1637_v40  ;;  %v1621_v45 = vld [vmem:[#allocation8 + $0x170] sm:$0xff] }
 0x33d   :  { %2644 = vmatpush1.bf16.msra.mxu1 %v2643_v56  ;;  %v1623_v56 = vld [vmem:[#allocation8 + $0x180] sm:$0xff] }
 0x33e   :  { %2646 = vmatprep.subr.bf16.mxu1 %v2645_v57  ;;  %v1624_v57 = vld [vmem:[#allocation8 + $0x188] sm:$0xff] }
 0x33f   :  { %v2685_v59 = vpack.c.bf16 %v1624_v57, %v1623_v56 }
 0x341   :  { %2648 = vmatpush1.bf16.msra.mxu1 %v2647_v62 }
 0x342   :  { %2650 = vmatprep.subr.bf16.mxu1 %v2649_v0 }
 0x345   :  { %2652 = vmatpush1.bf16.msra.mxu1 %v2651_v5 }
 0x346   :  { %2654 = vmatprep.subr.bf16.mxu1 %v2653_v6  ;;  %v1625_v6 = vld [vmem:[#allocation8 + $0x190] sm:$0xff] }
 0x348   :  { %1557 = vmatmul.mubr.f32.vlgmr.msra.gmra.mrb[6].mxu1 %v3057_v32  ;;  %v2669_v32 = vpack.c.bf16 %v1600_v24, %v1599_v23  ;;  %v2701_v24 = vpack.c.bf16 %v1632_v44, %v1631_v63  ;;  %v1889_v63 = vld [vmem:[%s3138_s8] ss:$0 sm:$0xff] }
 0x349   :  { %2656 = vmatpush3.bf16.msra.mxu1 %v2655_v11  ;;  %v2689_v11 = vpack.c.bf16 %v1626_v7, %v1625_v6  ;;  %v1791_v6 = vld [vmem:[%s3139_s9 + $0x28] sm:$0xff] }
 0x34a   :  { %2658 = vmatprep.subr.bf16.mxu1 %v2657_v12  ;;  %v1609_v12 = vld [vmem:[#allocation8 + $0x110] sm:$0xff] }
 0x34b   :  { %v2691_v14 = vpack.c.bf16 %v1610_v47, %v1609_v12  ;;  %v1795_v12 = vld [vmem:[%s3139_s9 + $0x48] sm:$0xff] }
 0x34d   :  { %2660 = vmatpush3.bf16.msra.mxu1 %v2659_v48  ;;  %v1611_v48 = vld [vmem:[#allocation8 + $0x120] sm:$0xff] }
 0x34e   :  { %2662 = vmatprep.subr.bf16.mxu1 %v2661_v16  ;;  %v1612_v16 = vld [vmem:[#allocation8 + $0x128] sm:$0xff] }
 0x34f   :  { %v2695_v49 = vpack.c.bf16 %v1612_v16, %v1611_v48  ;;  %v1800_v16 = vld [vmem:[%s3139_s9 + $0x70] sm:$0xff] }
 0x350   :  { %v2739_v18 = vpack.c.bf16 %v1801_v17, %v1800_v16 }
 0x351   :  { %2664 = vmatpush3.bf16.msra.mxu1 %v2663_v21  ;;  %v1613_v21 = vld [vmem:[#allocation8 + $0x130] sm:$0xff] }
 0x352   :  { %2666 = vmatprep.subr.bf16.mxu1 %v2665_v22  ;;  %v1614_v22 = vld [vmem:[#allocation8 + $0x138] sm:$0xff] }
 0x353   :  { %v2699_v23 = vpack.c.bf16 %v1614_v22, %v1613_v21 }
 0x355   :  { %2668 = vmatpush3.bf16.msra.mxu1 %v2667_v25  ;;  %v1615_v25 = vld [vmem:[#allocation8 + $0x140] sm:$0xff] }
 0x356   :  { %2670 = vmatprep.subr.bf16.mxu1 %v2669_v32  ;;  %v1616_v32 = vld [vmem:[#allocation8 + $0x148] sm:$0xff] }
 0x357   :  { %v2703_v29 = vpack.c.bf16 %v1616_v32, %v1615_v25 }
 0x359   :  { %2672 = vmatpush3.bf16.msra.mxu1 %v2671_v31  ;;  %v1617_v31 = vld [vmem:[#allocation8 + $0x150] sm:$0xff] }
 0x35a   :  { %2674 = vmatprep.subr.bf16.mxu1 %v2673_v33  ;;  %v1618_v33 = vld [vmem:[#allocation8 + $0x158] sm:$0xff] }
 0x35d   :  { %2676 = vmatpush3.bf16.msra.mxu1 %v2675_v36  ;;  %v2707_v36 = vpack.c.bf16 %v1618_v33, %v1617_v31 }
 0x35e   :  { %2678 = vmatprep.subr.bf16.mxu1 %v2677_v39  ;;  %v1620_v39 = vld [vmem:[#allocation8 + $0x168] sm:$0xff] }
 0x361   :  { %2680 = vmatpush3.bf16.msra.mxu1 %v2679_v42  ;;  %v2711_v42 = vpack.c.bf16 %v1620_v39, %v1619_v38 }
 0x362   :  { %2682 = vmatprep.subr.bf16.mxu1 %v2681_v52  ;;  %v1622_v52 = vld [vmem:[#allocation8 + $0x178] sm:$0xff] }
 0x363   :  { %v2715_v53 = vpack.c.bf16 %v1622_v52, %v1621_v45 }
 0x365   :  { %2684 = vmatpush3.bf16.msra.mxu1 %v2683_v55  ;;  %v1416_v55 = vrot.slane %v3064_v60, %v368_v19  ;;  %v1788_v19 = vld [vmem:[%s3139_s9 + $0x10] sm:$0xff]  ;;  %v2872_v60 = vmov 0.0|0.0  }
 0x366   :  { %2686 = vmatprep.subr.bf16.mxu1 %v2685_v59  ;;  %v2721_v4 = vpack.c.bf16 %v1789_v3, %v1788_v19 }
 0x3db   :  { %v1487_v62 = vpop.f32.mrb[4].mxu1 }
 0x3dc   :  { %v1488_v0 = vadd.f32 %v1487_v62, %v1404_v27  ;;  %v1489_v1 = vpop.f32.mrb[5].mxu1 }
 0x3dd   :  { %v1490_v2 = vadd.f32 %v1489_v1, %v1408_v61 }
 0x3de   :  { %v1567_v5 = vmul.f32 0.2, %v1488_v0  ;;  %vm1563_vm10 = vcmp.ge.f32.partialorder %v1488_v0, 0.0 }
 0x3df   :  { %v1568_v8 = vmul.f32 0.2, %v1490_v2  ;;  %vm1564_vm11 = vcmp.ge.f32.partialorder %v1490_v2, 0.0 }
 0x3e0   :  { %v1571_v13 = vsel %vm1563_vm10, %v1488_v0, %v1567_v5  ;;  %v1790_v5 = vld [vmem:[%s3139_s9 + $0x20] sm:$0xff] }
 0x3e1   :  { %v1572_v10 = vsel %vm1564_vm11, %v1490_v2, %v1568_v8  ;;  %v2718_v2 = vpack.c.bf16 %v1787_v46, %v1786_v51  ;;  %v2724_v7 = vpack.c.bf16 %v1791_v6, %v1790_v5  ;;  %v1792_v8 = vld [vmem:[%s3139_s9 + $0x30] sm:$0xff] }
 0x3e2   :  { %1710 = vmatprep.mubr.f32.mxu1 %v1572_v10 }
 0x3e3   :  { %1711 = vmatmul.mubr.f32.vlgmr.msra.gmra.mrb[8].mxu1 %v1571_v13  ;;  %v1796_v13 = vld [vmem:[%s3139_s9 + $0x50] sm:$0xff] }
 0x3e4   :  { %2688 = vmatpush3.bf16.msra.mxu1 %v2687_v9  ;;  %v1793_v9 = vld [vmem:[%s3139_s9 + $0x38] sm:$0xff]  ;;  %v2733_v58 = vpack.c.bf16 %v1797_v50, %v1796_v13 }
 0x3e5   :  { %2690 = vmatprep.subr.bf16.mxu1 %v2689_v11  ;;  %v2727_v10 = vpack.c.bf16 %v1793_v9, %v1792_v8  ;;  %v1794_v11 = vld [vmem:[%s3139_s9 + $0x40] sm:$0xff] }
 0x3e6   :  { %v2730_v47 = vpack.c.bf16 %v1795_v12, %v1794_v11 }
 0x3e8   :  { %2692 = vmatpush3.bf16.msra.mxu1 %v2691_v14  ;;  %v1798_v14 = vld [vmem:[%s3139_s9 + $0x60] sm:$0xff] }
 0x3e9   :  { %2694 = vmatprep.subr.bf16.mxu1 %v2693_v15  ;;  %v1799_v15 = vld [vmem:[%s3139_s9 + $0x68] sm:$0xff] }
 0x3ea   :  { %v2736_v48 = vpack.c.bf16 %v1799_v15, %v1798_v14 }
 0x3ec   :  { %2696 = vmatpush3.bf16.msra.mxu1 %v2695_v49  ;;  %v2874_v49 = vmov 0.0  }
 0x3ed   :  { %2698 = vmatprep.subr.bf16.mxu1 %v2697_v20 }
 0x3f0   :  { %2700 = vmatpush3.bf16.msra.mxu1 %v2699_v23 }
 0x3f1   :  { %2702 = vmatprep.subr.bf16.mxu1 %v2701_v24 }
 0x3f4   :  { %2704 = vmatpush3.bf16.msra.mxu1 %v2703_v29 }
 0x3f5   :  { %2706 = vmatprep.subr.bf16.mxu1 %v2705_v30 }
 0x3f8   :  { %2708 = vmatpush3.bf16.msra.mxu1 %v2707_v36 }
 0x3f9   :  { %2710 = vmatprep.subr.bf16.mxu1 %v2709_v37 }
 0x3fc   :  { %2712 = vmatpush3.bf16.msra.mxu1 %v2711_v42 }
 0x3fd   :  { %2714 = vmatprep.subr.bf16.mxu1 %v2713_v43 }
 0x400   :  { %2716 = vmatpush3.bf16.msra.mxu1 %v2715_v53 }
 0x401   :  { %2717 = vmatprep.subr.bf16.mxu1 %v2872_v60 }
 0x41b   :  { %v1558_v56 = vpop.f32.mrb[6].mxu1 }
 0x41c   :  { %v1559_v57 = vadd.f32 %v1558_v56, %v1412_v54  ;;  %v1560_v59 = vpop.f32.mrb[7].mxu1 }
 0x41d   :  { %v1561_v27 = vadd.f32 %v1560_v59, %v1416_v55 }
 0x41e   :  { %v1569_v61 = vmul.f32 0.2, %v1559_v57  ;;  %vm1565_vm12 = vcmp.ge.f32.partialorder %v1559_v57, 0.0 }
 0x41f   :  { %v1570_v62 = vmul.f32 0.2, %v1561_v27  ;;  %vm1566_vm13 = vcmp.ge.f32.partialorder %v1561_v27, 0.0 }
 0x420   :  { %v1573_v1 = vsel %vm1565_vm12, %v1559_v57, %v1569_v61 }
 0x421   :  { %v1574_v0 = vsel %vm1566_vm13, %v1561_v27, %v1570_v62 }
 0x422   :  { %1780 = vmatprep.mubr.f32.mxu1 %v1574_v0 }
 0x423   :  { %1781 = vmatmul.mubr.f32.vlgmr.msra.gmra.mrb[10].mxu1 %v1573_v1 }
 0x424   :  { %2719 = vmatpush3.bf16.msra.mxu1 %v2718_v2  ;;  %2010 = vmatprep.mubr.msk.f32.mxu1 %vm2873_vm14, %v2874_v49 }
 0x425   :  { %2720 = vmatprep.subr.bf16.mxu1 %v2872_v60 }
 0x428   :  { %2722 = vmatpush3.bf16.msra.mxu1 %v2721_v4 }
 0x429   :  { %2723 = vmatprep.subr.bf16.mxu1 %v2872_v60 }
 0x42c   :  { %2725 = vmatpush3.bf16.msra.mxu1 %v2724_v7 }
 0x42d   :  { %2726 = vmatprep.subr.bf16.mxu1 %v2872_v60 }
 0x430   :  { %2728 = vmatpush3.bf16.msra.mxu1 %v2727_v10 }
 0x431   :  { %2729 = vmatprep.subr.bf16.mxu1 %v2872_v60 }
 0x434   :  { %2731 = vmatpush3.bf16.msra.mxu1 %v2730_v47 }
 0x435   :  { %2732 = vmatprep.subr.bf16.mxu1 %v2872_v60 }
 0x438   :  { %2734 = vmatpush3.bf16.msra.mxu1 %v2733_v58 }
 0x439   :  { %2735 = vmatprep.subr.bf16.mxu1 %v2872_v60 }
 0x43c   :  { %2737 = vmatpush3.bf16.msra.mxu1 %v2736_v48 }
 0x43d   :  { %2738 = vmatprep.subr.bf16.mxu1 %v2872_v60 }
 0x440   :  { %2740 = vmatpush3.bf16.msra.mxu1 %v2739_v18 }
 0x4b6   :  { %v1923_v20 = vpop.f32.mrb[8].mxu1 }
 0x4b7   :  { %v1924_v21 = vpop.f32.mrb[9].mxu1 }
 0x4b8   :  { %v1925_v22 = vadd.f32 %v1924_v21, %v1923_v20 }
 0x4ba   :  { %v1713_v24 = vadd.f32 %v1925_v22, %v1889_v63 }
 0x4f6   :  { %v1958_v44 = vpop.f32.mrb[10].mxu1 }
 0x4f7   :  { %v1959_v23 = vpop.f32.mrb[11].mxu1 }
 0x4f8   :  { %v1960_v25 = vadd.f32 %v1959_v23, %v1958_v44 }
 0x4fa   :  { %v1783_v32 = vadd.f32 %v1960_v25, %v1713_v24 }
 0x4fc   :  { %2011 = vmatmul.mubr.f32.vlgmr.msra.gmra.mrb[12].mxu1 %v1783_v32 }
 0x5cf   :  { %v1875_v28 = vpop.f32.mrb[12].mxu1 }
 0x5d0   :  { %v1876_v29 = vadd.f32 %v1890_v26, %v1875_v28  ;;  %v2012_v30 = vpop.f32.mrb[13].mxu1 }
 0x5d2   :  { %1880 = vst.msk [vmem:[%s3141_s11] sm:$0x3] %vm1879_vm15, %v1876_v29 }
 0x5d3   :  { %1885 = vsyncpa [#allocation4], 1 }
 0x5d4   :  { %1886 = vsyncpa [#allocation6], 1 }
 0x5d5   :  { %1887 = vsyncpa [#allocation9], 1 }

</bundles_post_ra>
